<compile_context>
chip_gen: v6e
topology: v6e:2x2x1
jax: 0.10.0
libtpu: 0.0.40
codegen_flags: <defaults>
</compile_context>

<pallas_src>
import jax
import jax.numpy as jnp
from jax.experimental import pallas as pl
from jax.experimental.pallas import tpu as pltpu

BN_EPS = 1e-5
LANE = 128
TILE_M_CAP = 1024  # rows per tile in the BN+ReLU epilogue (512-1024 ~ 85% of HBM roofline)


def _round_up(x, m):
    return (x + m - 1) // m * m


def _vmem_limit_bytes():
    # Per-generation scoped-VMEM budget: ~3/4 of physical VMEM instead of a one-size 32 MiB.
    try:
        cap = pltpu.get_tpu_info().vmem_capacity_bytes
    except Exception:
        cap = 128 * 1024 * 1024
    return int(min(cap * 3 // 4, 100 * 1024 * 1024))


def _pick_row_block(h, w, cin_p, cout_p, itemsize, budget_bytes, forced=None):
    """Largest row-block (divisor of H) whose per-step VMEM footprint fits the budget."""
    if forced is not None:
        assert h % forced == 0, (h, forced)
        return forced

    def block_bytes(t):
        return (t * w * cout_p * 4                        # f32 accumulator
                + (t + 2) * w * 3 * cin_p * itemsize      # K-packed window slab
                + (t + 2) * (w + 2) * cin_p * itemsize    # padded input scratch
                + 2 * t * w * cin_p * itemsize            # main input block (double-buffered)
                + 4 * w * cin_p * itemsize                # halo rows (double-buffered)
                + 2 * t * w * cout_p * itemsize)          # conv output block (double-buffered)

    divisors = [t for t in range(1, h + 1) if h % t == 0]
    fitting = [t for t in divisors if block_bytes(t) <= budget_bytes]
    return max(fitting) if fitting else min(divisors)


# ---------------------------------------------------------------------------
# Kernel A: 3x3 conv (+ optional fused BN/ReLU of the previous layer on its input)
#           + per-(image, row-block) BN partial statistics
# ---------------------------------------------------------------------------
def _make_conv_kernel(*, apply_act, tile_h, w, cin_p, cout_p, n_row_blocks, compute_dtype):
    rows = tile_h * w

    def body(scale_ref, bias_ref, x_ref, xt_ref, xb_ref, w_ref, y_ref, sum_ref, m2_ref, xpad):
        r = pl.program_id(1)

        def stage(v):
            # Previous layer's folded BN + ReLU, applied in f32 while staging into VMEM.
            if apply_act:
                v = v.astype(jnp.float32) * scale_ref[0] + bias_ref[0]
                v = jnp.maximum(v, 0.0)
            return v.astype(compute_dtype)

        # Spatially padded block lives only in VMEM; rows/cols outside the image stay zero.
        xpad[...] = jnp.zeros_like(xpad)
        xpad[1:tile_h + 1, 1:w + 1, :] = stage(x_ref[0])

        @pl.when(r > 0)
        def _():                                            # top halo row (image row r*tile_h - 1)
            xpad[0:1, 1:w + 1, :] = stage(xt_ref[0])

        @pl.when(r < n_row_blocks - 1)
        def _():                                            # bottom halo row (image row (r+1)*tile_h)
            xpad[tile_h + 1:tile_h + 2, 1:w + 1, :] = stage(xb_ref[0])

        # Pack the three kx taps into the contraction dim once per block (3 sublane-shifted
        # copies total), then slice ky rows (outer-dim slice -> cheap) per matmul.
        slab = jnp.concatenate([xpad[:, dx:dx + w, :] for dx in range(3)], axis=-1)
        slab = slab.reshape((tile_h + 2) * w, 3 * cin_p)

        acc = jnp.zeros((rows, cout_p), jnp.float32)
        for dy in range(3):                                 # 3 MXU matmuls, K = 3*Cin_pad, f32 acc
            acc = acc + jnp.dot(slab[dy * w:dy * w + rows, :], w_ref[dy],
                                preferred_element_type=jnp.float32)

        # Pre-BN conv output stored in the compute dtype (bf16 fast path); stats stay in f32.
        y_ref[0] = acc.astype(y_ref.dtype)

        blk_sum = jnp.sum(acc, axis=0, keepdims=True)
        blk_mean = blk_sum * (1.0 / float(rows))
        sum_ref[0] = blk_sum
        m2_ref[0] = jnp.sum(jnp.square(acc - blk_mean), axis=0, keepdims=True)

    if apply_act:
        return body

    def body_no_act(x_ref, xt_ref, xb_ref, w_ref, y_ref, sum_ref, m2_ref, xpad):
        return body(None, None, x_ref, xt_ref, xb_ref, w_ref, y_ref, sum_ref, m2_ref, xpad)

    return body_no_act


def _conv_bn_partials(x_nhwc, w_packed, scale_in, bias_in, gamma_p, beta_p, *,
                      apply_act, compute_dtype, vmem_limit, row_block=None):
    """One conv layer: (optional fused input BN+ReLU) -> 3x3 conv -> folded BN scale/bias."""
    n, h, w, cin_p = x_nhwc.shape
    k3, kdim, cout_p = w_packed.shape
    assert k3 == 3 and kdim == 3 * cin_p, (w_packed.shape, cin_p)

    itemsize = jnp.dtype(compute_dtype).itemsize
    budget = max(4 * 1024 * 1024, vmem_limit // 4)
    tile_h = _pick_row_block(h, w, cin_p, cout_p, itemsize, budget, forced=row_block)
    nrb = h // tile_h
    rows = tile_h * w

    kern = _make_conv_kernel(apply_act=apply_act, tile_h=tile_h, w=w, cin_p=cin_p,
                             cout_p=cout_p, n_row_blocks=nrb, compute_dtype=compute_dtype)

    in_specs = []
    inputs = []
    if apply_act:
        in_specs += [pl.BlockSpec((1, cin_p), lambda i, r: (0, 0)),
                     pl.BlockSpec((1, cin_p), lambda i, r: (0, 0))]
        inputs += [scale_in, bias_in]
    in_specs += [
        # main rows of this row block
        pl.BlockSpec((1, tile_h, w, cin_p), lambda i, r: (i, r, 0, 0)),
        # 1-row halos above / below (clamped at the image edges; kernel zeroes edge halos)
        pl.BlockSpec((1, 1, w, cin_p),
                     lambda i, r: (i, jnp.maximum(r * tile_h - 1, 0), 0, 0)),
        pl.BlockSpec((1, 1, w, cin_p),
                     lambda i, r: (i, jnp.minimum((r + 1) * tile_h, h - 1), 0, 0)),
        # packed weights (3, 3*Cin_p, Cout_p), constant across the grid (stay resident)
        # TODO(synk): mark as pipeline_mode=pl.Buffered(1) once verified on all generations to
        # drop the redundant second weight buffer (matters at C >= 512 under v7x's 64 MiB VMEM).
        pl.BlockSpec((3, 3 * cin_p, cout_p), lambda i, r: (0, 0, 0)),
    ]
    inputs += [x_nhwc, x_nhwc, x_nhwc, w_packed]

    conv_out, sums, m2s = pl.pallas_call(
        kern,
        out_shape=(
            jax.ShapeDtypeStruct((n * nrb, rows, cout_p), compute_dtype),
            jax.ShapeDtypeStruct((n * nrb, 1, cout_p), jnp.float32),
            jax.ShapeDtypeStruct((n * nrb, 1, cout_p), jnp.float32),
        ),
        grid=(n, nrb),
        in_specs=in_specs,
        out_specs=(
            pl.BlockSpec((1, rows, cout_p), lambda i, r: (i * nrb + r, 0, 0)),
            pl.BlockSpec((1, 1, cout_p), lambda i, r: (i * nrb + r, 0, 0)),
            pl.BlockSpec((1, 1, cout_p), lambda i, r: (i * nrb + r, 0, 0)),
        ),
        scratch_shapes=[pltpu.VMEM((tile_h + 2, w + 2, cin_p), compute_dtype)],
        compiler_params=pltpu.CompilerParams(
            dimension_semantics=("parallel", "parallel"),
            vmem_limit_bytes=vmem_limit),
    )(*inputs)

    # Chan parallel-variance combine of the per-block partials -> training-mode (biased) batch
    # stats (avoids E[x^2]-mean^2 cancellation); fold gamma/beta into one scale/bias pair.
    total = float(n * h * w)
    s2 = sums[:, 0, :]
    m22 = m2s[:, 0, :]
    mean = jnp.sum(s2, axis=0) / total
    blk_mean = s2 / float(rows)
    var = (jnp.sum(m22, axis=0)
           + float(rows) * jnp.sum(jnp.square(blk_mean - mean[None, :]), axis=0)) / total
    scale = gamma_p * jax.lax.rsqrt(var + BN_EPS)
    bias = beta_p - mean * scale

    conv_nhwc = conv_out.reshape(n, h, w, cout_p)   # free reshape: layout already matches NHWC
    return conv_nhwc, scale.reshape(1, cout_p), bias.reshape(1, cout_p)


# ---------------------------------------------------------------------------
# Kernel B: fused BatchNorm (pre-folded scale/bias) + ReLU epilogue, tiled over M
# ---------------------------------------------------------------------------
def _bn_relu_kernel(y_ref, scale_ref, bias_ref, o_ref):
    y = y_ref[...].astype(jnp.float32)               # epilogue math in f32 on every generation
    o_ref[...] = jnp.maximum(y * scale_ref[...] + bias_ref[...], 0.0).astype(o_ref.dtype)


def _bn_relu(conv_nhwc, scale, bias, *, out_dtype, vmem_limit):
    n, h, w, c_p = conv_nhwc.shape
    m = n * h * w
    flat = conv_nhwc.reshape(m, c_p)
    tile_m = m if m <= TILE_M_CAP else TILE_M_CAP
    out = pl.pallas_call(
        _bn_relu_kernel,
        out_shape=jax.ShapeDtypeStruct((m, c_p), out_dtype),
        grid=(pl.cdiv(m, tile_m),),                    # ragged tail -> masked edge block
        in_specs=[pl.BlockSpec((tile_m, c_p), lambda i: (i, 0)),
                  pl.BlockSpec((1, c_p), lambda i: (0, 0)),
                  pl.BlockSpec((1, c_p), lambda i: (0, 0))],
        out_specs=pl.BlockSpec((tile_m, c_p), lambda i: (i, 0)),
        compiler_params=pltpu.CompilerParams(
            dimension_semantics=("parallel",),
            vmem_limit_bytes=vmem_limit),
    )(flat, scale.astype(jnp.float32), bias.astype(jnp.float32))
    return out.reshape(n, h, w, c_p)


# ---------------------------------------------------------------------------
# Parameter packing + full DoubleConv forward
# ---------------------------------------------------------------------------
def _prep_weight(wt, cin_p, cout_p, dtype):
    # PyTorch (Cout, Cin, 3, 3) -> (ky, kx, Cin, Cout) -> zero-pad channels
    #   -> pack kx into the contraction dim: (3, 3*Cin_p, Cout_p).
    cout, cin = wt.shape[0], wt.shape[1]
    wk = jnp.transpose(wt, (2, 3, 1, 0))
    wk = jnp.pad(wk, ((0, 0), (0, 0), (0, cin_p - cin), (0, cout_p - cout)))
    return wk.reshape(3, 3 * cin_p, cout_p).astype(dtype)


def _pad_vec(v, cp):
    return jnp.pad(v.astype(jnp.float32), (0, cp - v.shape[0]))


def double_conv(x_nchw, w1, g1, b1, w2, g2, b2, compute_dtype=jnp.bfloat16, row_block=None):
    """Forward of PyTorch DoubleConv (training-mode BatchNorm2d, biased variance, eps=1e-5)."""
    n, cin, h, w = x_nchw.shape
    cout = w1.shape[0]
    cin_p = _round_up(cin, LANE)
    cout_p = _round_up(cout, LANE)
    # TODO(synk): for tiny stem channel counts (Cin=3/4) keep the HBM last dim at the true
    # channel count and pad to lane width only inside VMEM, to avoid DMA-ing zero lanes.

    vmem_limit = _vmem_limit_bytes()

    # NCHW -> NHWC + channel pad + cast in one XLA pass.  No spatial pad in HBM: the 3x3 halo
    # is built in VMEM inside the conv kernel.
    x = jnp.transpose(x_nchw, (0, 2, 3, 1))
    x = jnp.pad(x, ((0, 0), (0, 0), (0, 0), (0, cin_p - cin))).astype(compute_dtype)

    w1p = _prep_weight(w1, cin_p, cout_p, compute_dtype)
    w2p = _prep_weight(w2, cout_p, cout_p, compute_dtype)

    # Layer 1: conv1 + BN1 partial stats (pre-BN activation stored in the compute dtype).
    y1, scale1, bias1 = _conv_bn_partials(
        x, w1p, None, None, _pad_vec(g1, cout_p), _pad_vec(b1, cout_p),
        apply_act=False, compute_dtype=compute_dtype, vmem_limit=vmem_limit,
        row_block=row_block)

    # Layer 2: BN1 + ReLU1 fused into the window loads (no extra HBM round-trip / XLA pad),
    # then conv2 + BN2 partial stats.
    y2, scale2, bias2 = _conv_bn_partials(
        y1, w2p, scale1, bias1, _pad_vec(g2, cout_p), _pad_vec(b2, cout_p),
        apply_act=True, compute_dtype=compute_dtype, vmem_limit=vmem_limit,
        row_block=row_block)

    # Final BN2 + ReLU2 epilogue.
    out = _bn_relu(y2, scale2, bias2, out_dtype=jnp.float32, vmem_limit=vmem_limit)

    # Strip channel padding + back to NCHW (one fused XLA pass; skip if a consumer takes NHWC).
    return jnp.transpose(out[..., :cout], (0, 3, 1, 2))


# ---------------------------------------------------------------------------
# Pure-JAX reference of the PyTorch forward (training-mode BatchNorm)
# ---------------------------------------------------------------------------
def _reference(x_nchw, w1, g1, b1, w2, g2, b2):
    def conv(x, wt):
        return jax.lax.conv_general_dilated(
            x, wt, window_strides=(1, 1), padding=((1, 1), (1, 1)),
            dimension_numbers=("NCHW", "OIHW", "NCHW"))

    def bn_relu(x, g, b):
        mean = jnp.mean(x, axis=(0, 2, 3), keepdims=True)
        var = jnp.mean(jnp.square(x - mean), axis=(0, 2, 3), keepdims=True)
        y = (x - mean) * jax.lax.rsqrt(var + BN_EPS)
        y = y * g.reshape(1, -1, 1, 1) + b.reshape(1, -1, 1, 1)
        return jnp.maximum(y, 0.0)

    y = bn_relu(conv(x_nchw, w1), g1, b1)
    return bn_relu(conv(y, w2), g2, b2)


if __name__ == "__main__":
    N, Cin, Cout, H, W = 2, 4, 8, 16, 16

    key = jax.random.PRNGKey(0)
    kx, kw1, kw2 = jax.random.split(key, 3)

    x = jax.random.normal(kx, (N, Cin, H, W), dtype=jnp.float32)
    w1 = 0.1 * jax.random.normal(kw1, (Cout, Cin, 3, 3), dtype=jnp.float32)
    w2 = 0.1 * jax.random.normal(kw2, (Cout, Cout, 3, 3), dtype=jnp.float32)
    # BatchNorm2d affine params: PyTorch default init (weight=1, bias=0).
    g1 = jnp.ones((Cout,), jnp.float32)
    b1 = jnp.zeros((Cout,), jnp.float32)
    g2 = jnp.ones((Cout,), jnp.float32)
    b2 = jnp.zeros((Cout,), jnp.float32)

    ref = _reference(x, w1, g1, b1, w2, g2, b2)

    # Strict guard: f32 operands everywhere + forced 8-row blocks (exercises the halo path and
    # the multi-row-block stats combine) against the XLA reference.
    out_f32 = jax.block_until_ready(
        double_conv(x, w1, g1, b1, w2, g2, b2, compute_dtype=jnp.float32, row_block=8))
    assert out_f32.shape == (N, Cout, H, W), out_f32.shape
    assert jnp.allclose(out_f32, ref, atol=3e-3, rtol=3e-3), \
        float(jnp.max(jnp.abs(out_f32 - ref)))

    # Fast path (default): bf16 MXU operands + bf16 inter-stage activations, f32 accumulation
    # and f32 BN/ReLU epilogue math; auto row-block choice.
    out_bf16 = jax.block_until_ready(double_conv(x, w1, g1, b1, w2, g2, b2))
    assert out_bf16.shape == (N, Cout, H, W), out_bf16.shape
    assert jnp.allclose(out_bf16, ref, atol=1e-1, rtol=1e-1), \
        float(jnp.max(jnp.abs(out_bf16 - ref)))

    print("KERNEL_OK")
</pallas_src>

<mosaic_0001>
module attributes {stable_mosaic.version = 11 : i64} {
  func.func @body_no_act(%arg0: i32, %arg1: i32, %arg2: memref<1x8x16x128xf32, #tpu.memory_space<vmem>>, %arg3: memref<1x1x16x128xf32, #tpu.memory_space<vmem>>, %arg4: memref<1x1x16x128xf32, #tpu.memory_space<vmem>>, %arg5: memref<3x384x128xf32, #tpu.memory_space<vmem>>, %arg6: memref<1x128x128xf32, #tpu.memory_space<vmem>>, %arg7: memref<1x1x128xf32, #tpu.memory_space<vmem>>, %arg8: memref<1x1x128xf32, #tpu.memory_space<vmem>>, %arg9: memref<10x18x128xf32, #tpu.memory_space<vmem>>) attributes {dimension_semantics = [#tpu.dimension_semantics<parallel>, #tpu.dimension_semantics<parallel>], iteration_bounds = array<i64: 2, 2>, scalar_prefetch = 0 : i64, scratch_operands = 1 : i64, tpu.core_type = #tpu.core_type<tc>, window_params = [{transform_indices = @transform_0, window_bounds = array<i64: 1, 8, 16, 128>}, {transform_indices = @transform_1, window_bounds = array<i64: 1, 1, 16, 128>}, {transform_indices = @transform_2, window_bounds = array<i64: 1, 1, 16, 128>}, {pipeline_mode = #tpu.pipeline_mode<synchronous>, transform_indices = @transform_3, window_bounds = array<i64: 3, 384, 128>}, {transform_indices = @transform_4, window_bounds = array<i64: 1, 128, 128>}, {transform_indices = @transform_5, window_bounds = array<i64: 1, 1, 128>}, {transform_indices = @transform_6, window_bounds = array<i64: 1, 1, 128>}]} {
    %cst = arith.constant 0.000000e+00 : f32
    %0 = vector.broadcast %cst : f32 to vector<10x18x128xf32>
    %c0 = arith.constant 0 : index
    %c0_0 = arith.constant 0 : index
    %c0_1 = arith.constant 0 : index
    %1 = vector.load %arg9[%c0, %c0_0, %c0_1] : memref<10x18x128xf32, #tpu.memory_space<vmem>>, vector<10x18x128xf32>
    tpu.vector_store %arg9[%c0, %c0_0, %c0_1], %0 {strides = array<i32>} : memref<10x18x128xf32, #tpu.memory_space<vmem>>, vector<10x18x128xf32>,
    %c0_2 = arith.constant 0 : index
    %c0_3 = arith.constant 0 : index
    %c0_4 = arith.constant 0 : index
    %c0_5 = arith.constant 0 : index
    %2 = vector.load %arg2[%c0_2, %c0_3, %c0_4, %c0_5] : memref<1x8x16x128xf32, #tpu.memory_space<vmem>>, vector<1x8x16x128xf32>
    %3 = vector.shape_cast %2 : vector<1x8x16x128xf32> to vector<8x16x128xf32>
    %c1 = arith.constant 1 : index
    %c1_6 = arith.constant 1 : index
    %c0_7 = arith.constant 0 : index
    %4 = vector.load %arg9[%c1, %c1_6, %c0_7] : memref<10x18x128xf32, #tpu.memory_space<vmem>>, vector<8x16x128xf32>
    tpu.vector_store %arg9[%c1, %c1_6, %c0_7], %3 {strides = array<i32>} : memref<10x18x128xf32, #tpu.memory_space<vmem>>, vector<8x16x128xf32>,
    %c0_i32 = arith.constant 0 : i32
    %5 = arith.cmpi sgt, %arg1, %c0_i32 : i32
    %6 = arith.extui %5 : i1 to i32
    %c0_i32_8 = arith.constant 0 : i32
    %7 = arith.cmpi ne, %6, %c0_i32_8 : i32
    scf.if %7 {
      %c0_43 = arith.constant 0 : index
      %c0_44 = arith.constant 0 : index
      %c0_45 = arith.constant 0 : index
      %c0_46 = arith.constant 0 : index
      %50 = vector.load %arg3[%c0_43, %c0_44, %c0_45, %c0_46] : memref<1x1x16x128xf32, #tpu.memory_space<vmem>>, vector<1x1x16x128xf32>
      %51 = vector.shape_cast %50 : vector<1x1x16x128xf32> to vector<1x16x128xf32>
      %c0_47 = arith.constant 0 : index
      %c1_48 = arith.constant 1 : index
      %c0_49 = arith.constant 0 : index
      %52 = vector.load %arg9[%c0_47, %c1_48, %c0_49] : memref<10x18x128xf32, #tpu.memory_space<vmem>>, vector<1x16x128xf32>
      tpu.vector_store %arg9[%c0_47, %c1_48, %c0_49], %51 {strides = array<i32>} : memref<10x18x128xf32, #tpu.memory_space<vmem>>, vector<1x16x128xf32>,
    } else {
    }
    %c1_i32 = arith.constant 1 : i32
    %8 = arith.cmpi slt, %arg1, %c1_i32 : i32
    %9 = arith.extui %8 : i1 to i32
    %c0_i32_9 = arith.constant 0 : i32
    %10 = arith.cmpi ne, %9, %c0_i32_9 : i32
    scf.if %10 {
      %c0_43 = arith.constant 0 : index
      %c0_44 = arith.constant 0 : index
      %c0_45 = arith.constant 0 : index
      %c0_46 = arith.constant 0 : index
      %50 = vector.load %arg4[%c0_43, %c0_44, %c0_45, %c0_46] : memref<1x1x16x128xf32, #tpu.memory_space<vmem>>, vector<1x1x16x128xf32>
      %51 = vector.shape_cast %50 : vector<1x1x16x128xf32> to vector<1x16x128xf32>
      %c9 = arith.constant 9 : index
      %c1_47 = arith.constant 1 : index
      %c0_48 = arith.constant 0 : index
      %52 = vector.load %arg9[%c9, %c1_47, %c0_48] : memref<10x18x128xf32, #tpu.memory_space<vmem>>, vector<1x16x128xf32>
      tpu.vector_store %arg9[%c9, %c1_47, %c0_48], %51 {strides = array<i32>} : memref<10x18x128xf32, #tpu.memory_space<vmem>>, vector<1x16x128xf32>,
    } else {
    }
    %c0_10 = arith.constant 0 : index
    %c0_11 = arith.constant 0 : index
    %c0_12 = arith.constant 0 : index
    %11 = vector.load %arg9[%c0_10, %c0_11, %c0_12] : memref<10x18x128xf32, #tpu.memory_space<vmem>>, vector<10x16x128xf32>
    %c0_13 = arith.constant 0 : index
    %c1_14 = arith.constant 1 : index
    %c0_15 = arith.constant 0 : index
    %12 = vector.load %arg9[%c0_13, %c1_14, %c0_15] : memref<10x18x128xf32, #tpu.memory_space<vmem>>, vector<10x16x128xf32>
    %c0_16 = arith.constant 0 : index
    %c2 = arith.constant 2 : index
    %c0_17 = arith.constant 0 : index
    %13 = vector.load %arg9[%c0_16, %c2, %c0_17] : memref<10x18x128xf32, #tpu.memory_space<vmem>>, vector<10x16x128xf32>
    %14 = tpu.concatenate %11, %12, %13 in 2 : vector<10x16x128xf32>, vector<10x16x128xf32>, vector<10x16x128xf32> -> vector<10x16x384xf32>
    %15 = vector.shape_cast %14 : vector<10x16x384xf32> to vector<160x384xf32>
    %cst_18 = arith.constant 0.000000e+00 : f32
    %16 = vector.broadcast %cst_18 : f32 to vector<128x128xf32>
    %17 = vector.extract_strided_slice %15 {offsets = [0, 0], sizes = [128, 384], strides = [1, 1]} : vector<160x384xf32> to vector<128x384xf32>
    %c0_19 = arith.constant 0 : index
    %c0_20 = arith.constant 0 : index
    %c0_21 = arith.constant 0 : index
    %18 = vector.load %arg5[%c0_19, %c0_20, %c0_21] : memref<3x384x128xf32, #tpu.memory_space<vmem>>, vector<1x384x128xf32>
    %19 = vector.shape_cast %18 : vector<1x384x128xf32> to vector<384x128xf32>
    %cst_22 = arith.constant dense<0.000000e+00> : vector<128x128xf32>
    %20 = tpu.matmul %17, %19, %cst_22 {dimension_numbers = #tpu.dot_dimension_numbers<[1], [0], [0], [1], [0, 0, 1, 1], [], []>} : vector<128x384xf32>, vector<384x128xf32>, vector<128x128xf32> -> vector<128x128xf32>
    %21 = arith.addf %16, %20 : vector<128x128xf32>
    %22 = vector.extract_strided_slice %15 {offsets = [16, 0], sizes = [128, 384], strides = [1, 1]} : vector<160x384xf32> to vector<128x384xf32>
    %c1_23 = arith.constant 1 : index
    %c0_24 = arith.constant 0 : index
    %c0_25 = arith.constant 0 : index
    %23 = vector.load %arg5[%c1_23, %c0_24, %c0_25] : memref<3x384x128xf32, #tpu.memory_space<vmem>>, vector<1x384x128xf32>
    %24 = vector.shape_cast %23 : vector<1x384x128xf32> to vector<384x128xf32>
    %cst_26 = arith.constant dense<0.000000e+00> : vector<128x128xf32>
    %25 = tpu.matmul %22, %24, %cst_26 {dimension_numbers = #tpu.dot_dimension_numbers<[1], [0], [0], [1], [0, 0, 1, 1], [], []>} : vector<128x384xf32>, vector<384x128xf32>, vector<128x128xf32> -> vector<128x128xf32>
    %26 = arith.addf %21, %25 : vector<128x128xf32>
    %27 = vector.extract_strided_slice %15 {offsets = [32, 0], sizes = [128, 384], strides = [1, 1]} : vector<160x384xf32> to vector<128x384xf32>
    %c2_27 = arith.constant 2 : index
    %c0_28 = arith.constant 0 : index
    %c0_29 = arith.constant 0 : index
    %28 = vector.load %arg5[%c2_27, %c0_28, %c0_29] : memref<3x384x128xf32, #tpu.memory_space<vmem>>, vector<1x384x128xf32>
    %29 = vector.shape_cast %28 : vector<1x384x128xf32> to vector<384x128xf32>
    %cst_30 = arith.constant dense<0.000000e+00> : vector<128x128xf32>
    %30 = tpu.matmul %27, %29, %cst_30 {dimension_numbers = #tpu.dot_dimension_numbers<[1], [0], [0], [1], [0, 0, 1, 1], [], []>} : vector<128x384xf32>, vector<384x128xf32>, vector<128x128xf32> -> vector<128x128xf32>
    %31 = arith.addf %26, %30 : vector<128x128xf32>
    %c0_31 = arith.constant 0 : index
    %c0_32 = arith.constant 0 : index
    %c0_33 = arith.constant 0 : index
    %32 = vector.load %arg6[%c0_31, %c0_32, %c0_33] : memref<1x128x128xf32, #tpu.memory_space<vmem>>, vector<1x128x128xf32>
    %33 = vector.shape_cast %32 : vector<1x128x128xf32> to vector<128x128xf32>
    %34 = vector.shape_cast %31 : vector<128x128xf32> to vector<1x128x128xf32>
    tpu.vector_store %arg6[%c0_31, %c0_32, %c0_33], %34 {strides = array<i32>} : memref<1x128x128xf32, #tpu.memory_space<vmem>>, vector<1x128x128xf32>,
    %cst_34 = arith.constant dense<0.000000e+00> : vector<128xf32>
    %35 = vector.multi_reduction <add>, %31, %cst_34 [0] : vector<128x128xf32> to vector<128xf32>
    %36 = vector.shape_cast %35 : vector<128xf32> to vector<1x128xf32>
    %cst_35 = arith.constant 7.812500e-03 : f32
    %37 = vector.broadcast %cst_35 : f32 to vector<1x128xf32>
    %38 = arith.mulf %36, %37 : vector<1x128xf32>
    %c0_36 = arith.constant 0 : index
    %c0_37 = arith.constant 0 : index
    %c0_38 = arith.constant 0 : index
    %39 = vector.load %arg7[%c0_36, %c0_37, %c0_38] : memref<1x1x128xf32, #tpu.memory_space<vmem>>, vector<1x1x128xf32>
    %40 = vector.shape_cast %39 : vector<1x1x128xf32> to vector<1x128xf32>
    %41 = vector.shape_cast %36 : vector<1x128xf32> to vector<1x1x128xf32>
    tpu.vector_store %arg7[%c0_36, %c0_37, %c0_38], %41 {strides = array<i32>} : memref<1x1x128xf32, #tpu.memory_space<vmem>>, vector<1x1x128xf32>,
    %42 = vector.broadcast %38 : vector<1x128xf32> to vector<128x128xf32>
    %43 = arith.subf %31, %42 : vector<128x128xf32>
    %44 = arith.mulf %43, %43 : vector<128x128xf32>
    %cst_39 = arith.constant dense<0.000000e+00> : vector<128xf32>
    %45 = vector.multi_reduction <add>, %44, %cst_39 [0] : vector<128x128xf32> to vector<128xf32>
    %46 = vector.shape_cast %45 : vector<128xf32> to vector<1x128xf32>
    %c0_40 = arith.constant 0 : index
    %c0_41 = arith.constant 0 : index
    %c0_42 = arith.constant 0 : index
    %47 = vector.load %arg8[%c0_40, %c0_41, %c0_42] : memref<1x1x128xf32, #tpu.memory_space<vmem>>, vector<1x1x128xf32>
    %48 = vector.shape_cast %47 : vector<1x1x128xf32> to vector<1x128xf32>
    %49 = vector.shape_cast %46 : vector<1x128xf32> to vector<1x1x128xf32>
    tpu.vector_store %arg8[%c0_40, %c0_41, %c0_42], %49 {strides = array<i32>} : memref<1x1x128xf32, #tpu.memory_space<vmem>>, vector<1x1x128xf32>,
    return
  }
  func.func @transform_0(%arg0: i32, %arg1: i32) -> (i32, i32, i32, i32) {
    %c0_i32 = arith.constant 0 : i32
    %c0_i32_0 = arith.constant 0 : i32
    %c0_i32_1 = arith.constant 0 : i32
    return %arg0, %arg1, %c0_i32, %c0_i32_0 : i32, i32, i32, i32
  }
  func.func @transform_1(%arg0: i32, %arg1: i32) -> (i32, i32, i32, i32) {
    %c8_i32 = arith.constant 8 : i32
    %0 = arith.muli %arg1, %c8_i32 : i32
    %c1_i32 = arith.constant 1 : i32
    %1 = arith.subi %0, %c1_i32 : i32
    %c0_i32 = arith.constant 0 : i32
    %2 = arith.maxsi %1, %c0_i32 : i32
    %c0_i32_0 = arith.constant 0 : i32
    %c0_i32_1 = arith.constant 0 : i32
    %c0_i32_2 = arith.constant 0 : i32
    return %arg0, %2, %c0_i32_0, %c0_i32_1 : i32, i32, i32, i32
  }
  func.func @transform_2(%arg0: i32, %arg1: i32) -> (i32, i32, i32, i32) {
    %c1_i32 = arith.constant 1 : i32
    %0 = arith.addi %arg1, %c1_i32 : i32
    %c8_i32 = arith.constant 8 : i32
    %1 = arith.muli %0, %c8_i32 : i32
    %c15_i32 = arith.constant 15 : i32
    %2 = arith.minsi %1, %c15_i32 : i32
    %c0_i32 = arith.constant 0 : i32
    %c0_i32_0 = arith.constant 0 : i32
    %c0_i32_1 = arith.constant 0 : i32
    return %arg0, %2, %c0_i32, %c0_i32_0 : i32, i32, i32, i32
  }
  func.func @transform_3(%arg0: i32, %arg1: i32) -> (i32, i32, i32) {
    %c0_i32 = arith.constant 0 : i32
    %c0_i32_0 = arith.constant 0 : i32
    %c0_i32_1 = arith.constant 0 : i32
    %c0_i32_2 = arith.constant 0 : i32
    return %c0_i32, %c0_i32_0, %c0_i32_1 : i32, i32, i32
  }
  func.func @transform_4(%arg0: i32, %arg1: i32) -> (i32, i32, i32) {
    %c2_i32 = arith.constant 2 : i32
    %0 = arith.muli %arg0, %c2_i32 : i32
    %1 = arith.addi %0, %arg1 : i32
    %c0_i32 = arith.constant 0 : i32
    %c0_i32_0 = arith.constant 0 : i32
    %c0_i32_1 = arith.constant 0 : i32
    return %1, %c0_i32, %c0_i32_0 : i32, i32, i32
  }
  func.func @transform_5(%arg0: i32, %arg1: i32) -> (i32, i32, i32) {
    %c2_i32 = arith.constant 2 : i32
    %0 = arith.muli %arg0, %c2_i32 : i32
    %1 = arith.addi %0, %arg1 : i32
    %c0_i32 = arith.constant 0 : i32
    %c0_i32_0 = arith.constant 0 : i32
    %c0_i32_1 = arith.constant 0 : i32
    return %1, %c0_i32, %c0_i32_0 : i32, i32, i32
  }
  func.func @transform_6(%arg0: i32, %arg1: i32) -> (i32, i32, i32) {
    %c2_i32 = arith.constant 2 : i32
    %0 = arith.muli %arg0, %c2_i32 : i32
    %1 = arith.addi %0, %arg1 : i32
    %c0_i32 = arith.constant 0 : i32
    %c0_i32_0 = arith.constant 0 : i32
    %c0_i32_1 = arith.constant 0 : i32
    return %1, %c0_i32, %c0_i32_0 : i32, i32, i32
  }
}

</mosaic_0001>

<bundles_post_ra>
// kernel: tpu_custom_call.1
= control target key start
LH: loop header
LB: loop body
LE: loop exit
PB: predicated region body
PF: predicated region fallthrough
CT: control target
= control target key end

     0   :  { %s4135_s0 = inlined_call_operand.hbm [shape: f32[2,16,16,128], index: 0, kind: input, shape index: {}]   ;;  %s4136_s1 = inlined_call_operand.hbm [shape: f32[2,16,16,128], index: 1, kind: input, shape index: {}]   ;;  %s4137_s2 = inlined_call_operand.hbm [shape: f32[2,16,16,128], index: 2, kind: input, shape index: {}]   ;;  %s4138_s3 = inlined_call_operand.hbm [shape: f32[3,384,128], index: 3, kind: input, shape index: {}]   ;;  %s4139_s4 = inlined_call_operand.hbm [shape: f32[4,128,128], index: 4, kind: output, shape index: {0}]   ;;  %s4140_s5 = inlined_call_operand.hbm [shape: f32[4,1,128], index: 5, kind: output, shape index: {1}]   ;;  %s4141_s6 = inlined_call_operand.hbm [shape: f32[4,1,128], index: 6, kind: output, shape index: {2}]  }
   0x1   :  { %4168 = sst [smem:[#allocation51_spill]] %s4135_s0 }
   0x2   :  { %4169 = sst [smem:[#allocation52_spill]] %s4136_s1 }
   0x3   :  { %4170 = sst [smem:[#allocation53_spill]] %s4137_s2 }
   0x4   :  { %4171 = sst [smem:[#allocation54_spill]] %s4138_s3 }
   0x5   :  { %4172 = sst [smem:[#allocation55_spill]] %s4139_s4 }
   0x6   :  { %4173 = sst [smem:[#allocation56_spill]] %s4140_s5 }
   0x7   :  { %4174 = sst [smem:[#allocation57_spill]] %s4141_s6 }
   0x8   :  { %12 = vsyncpa [#allocation4], 0 }
   0x9   :  { %14 = vsyncpa [#allocation4 + $0x1], 0 }
   0xa   :  { %15 = vsyncpa [#allocation7], 0 }
   0xb   :  { %17 = vsyncpa [#allocation7 + $0x1], 0 }
   0xc   :  { %18 = vsyncpa [#allocation10], 0 }
   0xd   :  { %19 = vsyncpa [#allocation5], 0 }
   0xe   :  { %21 = vsyncpa [#allocation5 + $0x1], 0 }
   0xf   :  { %22 = vsyncpa [#allocation13], 0 }
  0x10   :  { %24 = vsyncpa [#allocation13 + $0x1], 0  ;;  %s3122_s21 = smov 0   ;;  %s3124_s22 = smov 0  }
  0x11   :  { %s3126_s23 = smov 0   ;;  %s3128_s24 = smov 0  }
  0x12   :  { %s3130_s25 = smov 0   ;;  %s3132_s26 = smov 0  }
  0x13   :  { %s3134_s27 = smov 0   ;;  %s3136_s28 = smov 0  }
  0x14   :  { %s3138_s29 = smov 0   ;;  %s3140_s30 = smov 0  }
  0x15   :  { %s3142_s7 = smov 0   ;;  %s3144_s8 = smov 0  }
  0x16   :  { %s3146_s9 = smov 0   ;;  %s3148_s10 = smov 0  }
  0x17   :  { %s3150_s11 = smov 0   ;;  %s3152_s12 = smov 0  }
  0x18   :  { %s3154_s13 = smov 0  }
  0x19 LB: > { %4175 = sst [smem:[#allocation21_spill]] %s3021_s24  ;;  %s39_s14 = sadd.s32 1, %s3065_s11  ;;  %s3073_s13 = sphi %s3154_s13, %s30_s13   ;;  %s3069_s12 = sphi %s3152_s12, %s4281_s12   ;;  %s3065_s11 = sphi %s3150_s11, %s4280_s11   ;;  %s3061_s10 = sphi %s3148_s10, %s4279_s10   ;;  %s3057_s9 = sphi %s3146_s9, %s4278_s9   ;;  %s3053_s8 = sphi %s3144_s8, %s4277_s8   ;;  %s3049_s7 = sphi %s3142_s7, %s4276_s7   ;;  %s3045_s30 = sphi %s3140_s30, %s4275_s30   ;;  %s3041_s29 = sphi %s3138_s29, %s4274_s29   ;;  %s3037_s28 = sphi %s3136_s28, %s4286_s28   ;;  %s3033_s27 = sphi %s3134_s27, %s4285_s27   ;;  %s3029_s26 = sphi %s3132_s26, %s4302_s26   ;;  %s3025_s25 = sphi %s3130_s25, %s4272_s25   ;;  %s3021_s24 = sphi %s3128_s24, %s4271_s24   ;;  %s3017_s23 = sphi %s3126_s23, %s4284_s23   ;;  %s3013_s22 = sphi %s3124_s22, %s4283_s22   ;;  %s3009_s21 = sphi %s3122_s21, %s4282_s21  }
  0x1a   : > { %4176 = sst [smem:[#allocation22_spill]] %s3025_s25  ;;  %s42_s15 = sadd.s32 1, %s3069_s12 }
  0x1b   : > { %4177 = sst [smem:[#allocation23_spill]] %s3029_s26  ;;  %p40_p0 = scmp.ge.s32.totalorder %s39_s14, 2 }
  0x1c   : > { %4178 = sst [smem:[#allocation24_spill]] %s3041_s29  ;;  %p4156_p1 = scmp.eq.s32.totalorder %s3073_s13, 0 }
  0x1d   : > { %4179 = sst [smem:[#allocation25_spill]] %s3045_s30  ;;  %s1980_s16 = sshll.u32 %s3065_s11, 3 }
  0x1e   : > { %4180 = sst [smem:[#allocation26_spill]] %s3049_s7  ;;  %s87_s17 = sadd.s32 1, %s3041_s29 }
  0x1f   : > { %4181 = sst [smem:[#allocation27_spill]] %s3053_s8  ;;  %s4288_s14 = smov (%p40_p0, %s39_s14), 0 }
  0x20   : > { %4182 = sst [smem:[#allocation28_spill]] %s3057_s9  ;;  %s4290_s15 = smov (!%p40_p0, %s42_s15), %s3069_s12 }
  0x21   : > { %4183 = sst [smem:[#allocation29_spill]] %s3061_s10  ;;  %s47_s18 = ssub.s32 %s3065_s11, %s4288_s14 }
  0x22   : > { %4184 = sst [smem:[#allocation30_spill]] %s3065_s11  ;;  %s1981_s19 = sadd.s32 4294967295, %s1980_s16 }
  0x23   : > { %4185 = sst [smem:[#allocation31_spill]] %s3069_s12  ;;  %p44_p2 = scmp.ge.s32.totalorder %s4290_s15, 2 }
  0x24   : > { %4186 = sst [smem:[#allocation32_spill]] %s4288_s14  ;;  %p76_p3 = scmp.gt.s32.totalorder %s1981_s19, 0 }
  0x25   : > { %s1982_s20 = sshll.u32 %s4288_s14, 3  ;;  %p94_p4 = scmp.ne.s32.totalorder %s3041_s29, %s3037_s28 }
  0x26   : > { %s4292_s15 = smov (%p44_p2, %s4290_s15), 0  ;;  %s4294_s19 = smov (!%p76_p3, %s1981_s19), 0 }
  0x27   : > { %4187 = sst [smem:[#allocation33_spill]] %s4292_s15  ;;  %s3226_s6 = ssub.s32 %s3069_s12, %s4292_s15 }
  0x28   : > { %4188 = sst [smem:[#allocation34_spill]] %s3226_s6  ;;  %s1983_s5 = sadd.s32 4294967295, %s1982_s20 }
  0x29   : > { %s3229_s4 = sor.u32 %s47_s18, %s3226_s6  ;;  %p80_p5 = scmp.gt.s32.totalorder %s1983_s5, 0 }
  0x2a   : > { %p3234_p7 = por %p94_p4, %p4156_p1  ;;  %p100_p8 = scmp.ne.s32.totalorder %s3037_s28, %s3033_s27 }
  0x2b   : > { %s4296_s5 = smov (!%p80_p5, %s1983_s5), 0  ;;  %s3240_s9 = sadd.s32 8, %s1980_s16 }
  0x2c   : > { %4190 = sst [smem:[#allocation35_spill]] %s3240_s9  ;;  %s83_s18 = ssub.s32 %s4294_s19, %s4296_s5 }
  0x2d   : > { %s84_s2 = sor.u32 %s83_s18, %s3226_s6  ;;  %s3245_s24 = sadd.s32 8, %s1982_s20 }
  0x2e   : > { %4191 = sst [smem:[#allocation36_spill]] %s3245_s24  ;;  %p85_p10 = scmp.eq.s32.totalorder %s84_s2, 0 }
  0x2f   : > { %s1986_s25 = sshll.u32 %s3069_s12, 1  ;;  %s1987_s26 = sshll.u32 %s4292_s15, 1 }
  0x30   : > { %s3251_s0 = scalar_select %p85_p10, %s3041_s29, %s87_s17  }
  0x31   : > { %s168_s30 = sadd.s32 %s3065_s11, %s1986_s25  ;;  %s170_s16 = sadd.s32 %s1987_s26, %s4288_s14 }
  0x32   : > { %4192 = sst [smem:[#allocation37_spill]] %s3251_s0  ;;  %s171_s7 = ssub.s32 %s168_s30, %s170_s16 }
  0x33   : > { %p3255_p12 = scmp.eq.s32.totalorder %s171_s7, 0  ;;  %p4155_p13 = scmp.lt.s32.totalorder %s3073_s13, 4 }
  0x34   : > { %s3261_s18 = sshll.u32 %s3069_s12, 5  ;;  %s308_s20 = sand.u32 1, %s3073_s13  }
  0x35   : > { %s310_s2 = sand.u32 1, %s3041_s29   ;;  %s2003_s24 = sshll.u32 %s4294_s19, 1 }
  0x36   : > { %s2000_s6 = sshll.u32 %s310_s2, 4  ;;  %s322_s15 = sadd.s32 %s2003_s24, %s3261_s18 }
  0x37   : > { %s2005_s17 = sshll.u32 %s322_s15, 7  ;;  %s312_s0 = scalar_lea.vmem [#allocation6], %s2000_s6 }
  0x38   : > { %s325_s25 = sshll.u32 %s312_s0, 4  ;;  %s4194_s1 = sld [smem:[#allocation52_spill]]  ;;  %s326_s25 = int_to_ptr.vmem [resolvable:$true] %s325_s25 }
  0x39   : > { %p3274_p0 = pnand %p4155_p13, %p3234_p7  ;;  %s3278_s7 = scalar_lea.sflag [#allocation7], %s308_s20 }
  0x3a   : > { %s2740_s24 = scalar_lea.vmem %s326_s25, 256  ;;  %s3075_s0 = smov [#allocation6]  }
  0x3b   : > { %p2729_p2 = pneg %p3274_p0  ;;  %p2741_p3 = scmp.ne.s32.totalorder %s326_s25, %s2740_s24 }
  0x3c   : > { %s2745_s6 = sshll.u32 %s3075_s0, 4  ;;  %s2746_s6 = int_to_ptr.vmem [resolvable:$false] %s2745_s6 }
  0x3d   : > { %p2743_p4 = pnand %p2741_p3, %p2729_p2  ;;  %s2747_s9 = scalar_lea.vmem %s2746_s6, 512 }
  0x3e   : > { %s324_s26 = scalar_lea.hbm %s4194_s1, %s2005_s17  ;;  %p2748_p10 = scmp.lt.s32.totalorder %s326_s25, %s2746_s6 }
  0x3f   : > { %p2744_p5 = pneg %p2743_p4  ;;  %p2749_p11 = scmp.lt.s32.totalorder %s2747_s9, %s2740_s24 }
  0x41   : > { %p2750_p9 = por %p2749_p11, %p2748_p10 }
  0x43   : > { %p2751_p7 = pnand %p2750_p9, %p2744_p5 }
  0x45   : > { %2754 = shalt.err (!%p2751_p7)
}
  0x46   : > { %s4161_s10 = smov 128   ;;  %s4165_s11 = smov 8  }
  0x47   : > { %2567 = dma.hbm_to_vmem [thread:$0]  (!%p3274_p0), %s324_s26, 256, %s326_s25, %s3278_s7, %s4161_s10, %s4161_s10, %s4165_s11  }
  0x48   : > { %s3289_s15 = sadd.s32 4294967295, %s3073_s13   ;;  %s4157_s19 = sadd.s32 4294967294, %s3073_s13  }
  0x49   : > { %p4163_p9 = scmp.eq.s32.totalorder %s3289_s15, 0  ;;  %s174_s16 = sadd.s32 1, %s3017_s23 }
  0x4a   : > { %s3297_s20 = scalar_select %p3255_p12, %s3017_s23, %s174_s16  }
  0x4b   : > { %p3304_p11 = por %p100_p8, %p4163_p9  ;;  %p184_p0 = scmp.ne.s32.totalorder %s3017_s23, %s3013_s22 }
  0x4c   : > { %4196 = sst [smem:[#allocation38_spill]] %s3297_s20  ;;  %p185_p2 = scmp.eq.s32.totalorder %s3289_s15, 3 }
  0x4d   : > { %p190_p3 = scmp.ne.s32.totalorder %s3013_s22, %s3009_s21  ;;  %p191_p4 = scmp.eq.s32.totalorder %s4157_s19, 3 }
  0x4e   : > { %p1992_p5 = scmp.ge.s32.totalorder %s3073_s13, 1  ;;  %p3316_p10 = por %p185_p2, %p184_p0 }
  0x4f   : > { %p258_p7 = scmp.lt.s32.totalorder %s3073_s13, 5  ;;  %p3321_p12 = por %p191_p4, %p190_p3 }
  0x50   : > { %s4198_s17 = scalar_select %p3316_p10, 1, 0 }
  0x51   : > { %s4199_s5 = scalar_select %p3321_p12, 1, 0 }
  0x52   : > { %p3325_p13 = pnand %p1992_p5, %p258_p7  ;;  %s3078_s25 = smov [#allocation9]  }
  0x53   : > { %s270_s26 = sshll.u32 %s3078_s25, 4  ;;  %s51_s30 = sadd.s32 1, %s3053_s8  ;;  %s271_s26 = int_to_ptr.vmem [resolvable:$true] %s270_s26 }
  0x54   : > { %p2557_p8 = pneg %p3325_p13  ;;  %s2766_s24 = scalar_lea.vmem %s271_s26, 18432 }
  0x55   : > { %p2767_p1 = scmp.ne.s32.totalorder %s271_s26, %s2766_s24  ;;  %p2774_p6 = scmp.lt.s32.totalorder %s271_s26, %s271_s26 }
  0x56   : > { %p2558_p0 = pnand %p2557_p8, %p4163_p9  ;;  %p2775_p12 = scmp.lt.s32.totalorder %s2766_s24, %s2766_s24 }
  0x58   : > { %p2757_p2 = pneg %p2558_p0  ;;  %p2776_p5 = por %p2775_p12, %p2774_p6 }
  0x5a   : > { %p2769_p3 = pnand %p2767_p1, %p2757_p2 }
  0x5c   : > { %p2770_p4 = pneg %p2769_p3 }
  0x5e   : > { %p2777_p7 = pnand %p2776_p5, %p2770_p4 }
  0x60   : > { %2780 = shalt.err (!%p2777_p7)
}
  0x61   : > { %s4201_s3 = sld [smem:[#allocation54_spill]]  ;;  %p4205_p1 = scmp.eq.s32.totalorder %s3229_s4, 0 }
  0x62   : > { %s4202_s9 = sld [smem:[#allocation26_spill]]  ;;  %s284_s19 = sand.u32 1, %s3053_s8  }
  0x63   : > { %s4203_s16 = sld [smem:[#allocation25_spill]]  ;;  %p4207_p8 = scmp.eq.s32.totalorder %s3073_s13, 0 }
  0x64   : > { %s4204_s25 = sld [smem:[#allocation30_spill]]  ;;  %s1995_s1 = sshll.u32 %s284_s19, 7 }
  0x65   : > { %s3343_s24 = scalar_select %p4205_p1, %s3053_s8, %s51_s30  }
  0x66   : > { %s288_s29 = scalar_lea.vmem [#allocation3], %s1995_s1  ;;  %s4209_s30 = sld [smem:[#allocation51_spill]] }
  0x67   : > { %2560 = dma.hbm_to_vmem [thread:$0]  (!%p2558_p0), %s4201_s3, 18432, %s271_s26, [#allocation10], %s4161_s10, %s4161_s10, %s4165_s11  }
  0x68   : > { %4206 = sst [smem:[#allocation39_spill]] %s3343_s24  ;;  %p58_p6 = scmp.ne.s32.totalorder %s3053_s8, %s4202_s9 }
  0x69   : > { %p64_p12 = scmp.ne.s32.totalorder %s4202_s9, %s4203_s16  ;;  %s298_s20 = sshll.u32 %s288_s29, 4  ;;  %s299_s20 = int_to_ptr.vmem [resolvable:$true] %s298_s20 }
  0x6a   : > { %s2033_s0 = sshll.u32 %s4204_s25, 4  ;;  %p60_p2 = por %p4207_p8, %p58_p6 }
  0x6b   : > { %p3355_p3 = por %p4163_p9, %p64_p12  ;;  %s295_s14 = sadd.s32 %s2033_s0, %s3261_s18 }
  0x6c   : > { %s1999_s12 = sshll.u32 %s295_s14, 7  ;;  %p4210_p0 = scmp.lt.s32.totalorder %s3073_s13, 4 }
  0x6d   : > { %s297_s10 = scalar_lea.hbm %s4209_s30, %s1999_s12  ;;  %s285_s16 = scalar_lea.sflag [#allocation4], %s284_s19 }
  0x6e   : > { %p3365_p4 = pnand %p4210_p0, %p60_p2  ;;  %s2794_s25 = scalar_lea.vmem %s299_s20, 2048 }
  0x6f   : > { %p2795_p7 = scmp.ne.s32.totalorder %s299_s20, %s2794_s25  ;;  %s3079_s1 = smov [#allocation3]  }
  0x70   : > { %p2783_p5 = pneg %p3365_p4  ;;  %s2799_s29 = sshll.u32 %s3079_s1, 4  ;;  %s2800_s29 = int_to_ptr.vmem [resolvable:$false] %s2799_s29 }
  0x71   : > { %s2801_s14 = scalar_lea.vmem %s2800_s29, 4096  ;;  %p2802_p12 = scmp.lt.s32.totalorder %s299_s20, %s2800_s29 }
  0x72   : > { %p2797_p1 = pnand %p2795_p7, %p2783_p5  ;;  %p2803_p8 = scmp.lt.s32.totalorder %s2801_s14, %s2794_s25 }
  0x74   : > { %p2798_p6 = pneg %p2797_p1  ;;  %p2804_p9 = por %p2803_p8, %p2802_p12 }
  0x76   : > { %p2805_p10 = pnand %p2804_p9, %p2798_p6 }
  0x78   : > { %2808 = shalt.err (!%p2805_p10)
}
  0x79   : > { %s4212_s12 = smov 128   ;;  %s4213_s19 = sld [smem:[#allocation35_spill]] }
  0x7a   : > { %s4214_s0 = sld [smem:[#allocation36_spill]]  ;;  %p4221_p5 = scmp.eq.s32.totalorder %s3073_s13, 0 }
  0x7b   : > { %s4215_s26 = sld [smem:[#allocation23_spill]]  ;;  %p4223_p6 = scmp.eq.s32.totalorder %s3289_s15, 0 }
  0x7c   : > { %s4216_s4 = sld [smem:[#allocation22_spill]] }
  0x7d   : > { %s4217_s30 = sld [smem:[#allocation21_spill]] }
  0x7e   : > { %s4218_s1 = sld [smem:[#allocation34_spill]] }
  0x7f   : > { %2564 = dma.hbm_to_vmem [thread:$0]  (!%p3365_p4), %s297_s10, 2048, %s299_s20, %s285_s16, %s4212_s12, %s4212_s12, %s4165_s11  }
  0x80   : > { %p4219_p9 = scmp.lt.s32.totalorder %s4213_s19, 15  ;;  %p4220_p10 = scmp.lt.s32.totalorder %s4214_s0, 15 }
  0x81   : > { %s123_s9 = sadd.s32 1, %s4215_s26  ;;  %s337_s20 = sand.u32 1, %s4215_s26  }
  0x82   : > { %s4298_s19 = smov (!%p4219_p9, %s4213_s19), 15  ;;  %s4300_s0 = smov (!%p4220_p10, %s4214_s0), 15 }
  0x83   : > { %p130_p2 = scmp.ne.s32.totalorder %s4215_s26, %s4216_s4  ;;  %s119_s25 = ssub.s32 %s4298_s19, %s4300_s0 }
  0x84   : > { %p136_p0 = scmp.ne.s32.totalorder %s4216_s4, %s4217_s30  ;;  %s120_s29 = sor.u32 %s119_s25, %s4218_s1 }
  0x85   : > { %p3390_p7 = por %p130_p2, %p4221_p5  ;;  %p121_p1 = scmp.eq.s32.totalorder %s120_s29, 0 }
  0x86   : > { %p3396_p12 = por %p136_p0, %p4223_p6  ;;  %s2008_s16 = sshll.u32 %s4298_s19, 1 }
  0x87   : > { %s4302_s26 = smov (!%p121_p1, %s4215_s26), %s123_s9  ;;  %s2006_s0 = sshll.u32 %s337_s20, 4 }
  0x88   : > { %s4224_s10 = scalar_select %p3396_p12, 1, 0 }
  0x89   : > { %s349_s11 = sadd.s32 %s2008_s16, %s3261_s18  ;;  %s4225_s25 = sld [smem:[#allocation53_spill]] }
  0x8a   : > { %s2010_s4 = sshll.u32 %s349_s11, 7  ;;  %s339_s24 = scalar_lea.vmem [#allocation8], %s2006_s0 }
  0x8b   : > { %s352_s8 = sshll.u32 %s339_s24, 4  ;;  %p4226_p4 = scmp.lt.s32.totalorder %s3073_s13, 4  ;;  %s353_s8 = int_to_ptr.vmem [resolvable:$true] %s352_s8 }
  0x8c   : > { %s2822_s19 = scalar_lea.vmem %s353_s8, 256  ;;  %s3080_s18 = smov [#allocation8]  }
  0x8d   : > { %p3412_p8 = pnand %p4226_p4, %p3390_p7  ;;  %p2823_p10 = scmp.ne.s32.totalorder %s353_s8, %s2822_s19 }
  0x8e   : > { %s2827_s11 = sshll.u32 %s3080_s18, 4  ;;  %s2828_s11 = int_to_ptr.vmem [resolvable:$false] %s2827_s11 }
  0x8f   : > { %s351_s3 = scalar_lea.hbm %s4225_s25, %s2010_s4  ;;  %p2811_p9 = pneg %p3412_p8 }
  0x90   : > { %s2829_s9 = scalar_lea.vmem %s2828_s11, 512  ;;  %p2830_p5 = scmp.lt.s32.totalorder %s353_s8, %s2828_s11 }
  0x91   : > { %p2825_p2 = pnand %p2823_p10, %p2811_p9  ;;  %p2831_p1 = scmp.lt.s32.totalorder %s2829_s9, %s2822_s19 }
  0x93   : > { %p2826_p0 = pneg %p2825_p2  ;;  %p2832_p6 = por %p2831_p1, %p2830_p5 }
  0x95   : > { %p2833_p12 = pnand %p2832_p6, %p2826_p0 }
  0x97   : > { %2836 = shalt.err (!%p2833_p12)
}
  0x98   : > { %s4228_s24 = smov 8   ;;  %364 = sbr.rel (%p3325_p13) target bundleno = 731 (0x2db), region = 36 }
  0x99   : > { %2570 = dma.hbm_to_vmem [thread:$0]  (!%p3412_p8), %s351_s3, 256, %s353_s8, %s3278_s7, %s4212_s12, %s4212_s12, %s4228_s24  }
  0x9d   : > { %s4229_s14 = sld [smem:[#allocation26_spill]] }
  0xa3   : > { %s366_s20 = sand.u32 1, %s4229_s14  }
  0xa4   : > { %s2012_s16 = sshll.u32 %s366_s20, 7  ;;  %s367_s0 = scalar_lea.sflag [#allocation4], %s366_s20 }
  0xa5   : > { %s3427_s4 = scalar_lea.vmem [#allocation3], %s2012_s16 }
  0xa6   : > { %2984 = dma.done.wait (%p3355_p3), %s367_s0, 2048  }
  0xa7   : > { %2986 = vsyncadd (%p3355_p3), %s367_s0, 4294965248  ;;  %s375_s3 = sand.u32 1, %s3289_s15   ;;  %s377_s8 = sand.u32 1, %s3037_s28  }
  0xa8   : > { %s3435_s7 = sshll.u32 %s377_s8, 4  ;;  %s376_s27 = scalar_lea.sflag [#allocation7], %s375_s3 }
  0xa9   : > { %s379_s12 = scalar_lea.vmem [#allocation6], %s3435_s7 }
  0xaa   : > { %2988 = dma.done.wait (%p3304_p11), %s376_s27, 256  }
  0xab   : > { %2990 = vsyncadd (%p3304_p11), %s376_s27, 4294967040  ;;  %s4230_s30 = sld [smem:[#allocation22_spill]]  ;;  %p4231_p13 = scmp.ne.s32.totalorder %s4224_s10, 0 }
  0xb1   : > { %s386_s6 = sand.u32 1, %s4230_s30  }
  0xb2   : > { %s3445_s1 = sshll.u32 %s386_s6, 4 }
  0xb3   : > { %s388_s25 = scalar_lea.vmem [#allocation8], %s3445_s1 }
  0xb4   : > { %2992 = dma.done.wait (%p4231_p13), %s376_s27, 256  }
  0xb5   : > { %2994 = vsyncadd (%p4231_p13), %s376_s27, 4294967040  ;;  %p4232_p3 = scmp.eq.s32.totalorder %s3289_s15, 0 }
  0xb7   : > { %2996 = dma.done.wait (%p4232_p3), [#allocation10], 18432   ;;  %p4233_p7 = pmov %p4232_p3 }
  0xb8   : > { %s3457_s2 = sand.u32 1, %s3013_s22   ;;  %v3081_v0 = vmov 0.0   ;;  %v484_v1 = vld [vmem:[%s3427_s4] sm:$0xff]  ;;  %v485_v2 = vld [vmem:[%s3427_s4 + $0x8] sm:$0xff]  ;;  %v486_v3 = vld [vmem:[%s3427_s4 + $0x10] sm:$0xff]  ;;  %s4234_s11 = sld [smem:[#allocation28_spill]] }
  0xb9   : > { %2998 = vsyncadd (%p4233_p7), [#allocation10], 4294948864  ;;  %457 = vst [vmem:[#allocation2 + $0x18] sm:$0xff] %v3081_v0  ;;  %s2016_s10 = sshll.u32 %s3457_s2, 7  ;;  %v487_v4 = vld [vmem:[%s3427_s4 + $0x18] sm:$0xff]  ;;  %v488_v5 = vld [vmem:[%s3427_s4 + $0x20] sm:$0xff] }
  0xba   : > { %454 = vst [vmem:[#allocation2] sm:$0xff] %v3081_v0  ;;  %455 = vst [vmem:[#allocation2 + $0x8] sm:$0xff] %v3081_v0  ;;  %v489_v6 = vld [vmem:[%s3427_s4 + $0x28] sm:$0xff]  ;;  %v490_v7 = vld [vmem:[%s3427_s4 + $0x30] sm:$0xff]  ;;  %s3478_s29 = scalar_lea.vmem [#allocation11], %s2016_s10  ;;  %s432_s19 = scalar_lea.vmem [#allocation12], %s3457_s2 }
  0xbb   : > { %456 = vst [vmem:[#allocation2 + $0x10] sm:$0x3] %v3081_v0  ;;  %458 = vst [vmem:[#allocation2 + $0x20] sm:$0xff] %v3081_v0  ;;  %v491_v8 = vld [vmem:[%s3427_s4 + $0x38] sm:$0xff]  ;;  %v492_v9 = vld [vmem:[%s3427_s4 + $0x40] sm:$0xff]  ;;  %s438_s18 = scalar_lea.vmem [#allocation14], %s3457_s2 }
  0xbc   : > { %459 = vst [vmem:[#allocation2 + $0x28] sm:$0x3] %v3081_v0  ;;  %460 = vst [vmem:[#allocation2 + $0x30] sm:$0xff] %v3081_v0  ;;  %v493_v10 = vld [vmem:[%s3427_s4 + $0x48] sm:$0xff]  ;;  %v494_v11 = vld [vmem:[%s3427_s4 + $0x50] sm:$0xff] }
  0xbd   : > { %461 = vst [vmem:[#allocation2 + $0x38] sm:$0xff] %v3081_v0  ;;  %462 = vst [vmem:[#allocation2 + $0x40] sm:$0x3] %v3081_v0  ;;  %v495_v12 = vld [vmem:[%s3427_s4 + $0x58] sm:$0xff]  ;;  %v496_v13 = vld [vmem:[%s3427_s4 + $0x60] sm:$0xff] }
  0xbe   : > { %463 = vst [vmem:[#allocation2 + $0x48] sm:$0xff] %v3081_v0  ;;  %464 = vst [vmem:[#allocation2 + $0x50] sm:$0xff] %v3081_v0  ;;  %v497_v14 = vld [vmem:[%s3427_s4 + $0x68] sm:$0xff]  ;;  %v498_v15 = vld [vmem:[%s3427_s4 + $0x70] sm:$0xff]  ;;  %p2017_p11 = scmp.le.s32.totalorder %s4234_s11, 0 }
  0xbf   : > { %465 = vst [vmem:[#allocation2 + $0x58] sm:$0x3] %v3081_v0  ;;  %466 = vst [vmem:[#allocation2 + $0x60] sm:$0xff] %v3081_v0  ;;  %v499_v16 = vld [vmem:[%s3427_s4 + $0x78] sm:$0xff] }
  0xc0   : > { %467 = vst [vmem:[#allocation2 + $0x68] sm:$0xff] %v3081_v0  ;;  %468 = vst [vmem:[#allocation2 + $0x70] sm:$0x3] %v3081_v0 }
  0xc1   : > { %469 = vst [vmem:[#allocation2 + $0x78] sm:$0xff] %v3081_v0  ;;  %470 = vst [vmem:[#allocation2 + $0x80] sm:$0xff] %v3081_v0 }
  0xc2   : > { %471 = vst [vmem:[#allocation2 + $0x88] sm:$0x3] %v3081_v0  ;;  %472 = vst [vmem:[#allocation2 + $0x90] sm:$0xff] %v3081_v0 }
  0xc3   : > { %473 = vst [vmem:[#allocation2 + $0x98] sm:$0xff] %v3081_v0  ;;  %474 = vst [vmem:[#allocation2 + $0xa0] sm:$0x3] %v3081_v0 }
  0xc4   : > { %475 = vst [vmem:[#allocation2 + $0xa8] sm:$0xff] %v3081_v0  ;;  %476 = vst [vmem:[#allocation2 + $0xb0] sm:$0xff] %v3081_v0 }
  0xc5   : > { %477 = vst [vmem:[#allocation2 + $0xb8] sm:$0x3] %v3081_v0  ;;  %478 = vst [vmem:[#allocation2 + $0xc0] sm:$0xff] %v3081_v0 }
  0xc6   : > { %479 = vst [vmem:[#allocation2 + $0xc8] sm:$0xff] %v3081_v0  ;;  %480 = vst [vmem:[#allocation2 + $0xd0] sm:$0x3] %v3081_v0 }
  0xc7   : > { %481 = vst [vmem:[#allocation2 + $0xd8] sm:$0xff] %v3081_v0  ;;  %482 = vst [vmem:[#allocation2 + $0xe0] sm:$0xff] %v3081_v0 }
  0xc8   : > { %483 = vst [vmem:[#allocation2 + $0xe8] sm:$0x3] %v3081_v0  ;;  %501 = vst [vmem:[#allocation2 + $0x19] sm:$0xff] %v484_v1 }
  0xc9   : > { %502 = vst [vmem:[#allocation2 + $0x21] sm:$0xff] %v485_v2  ;;  %503 = vst [vmem:[#allocation2 + $0x31] sm:$0xff] %v486_v3 }
  0xca   : > { %504 = vst [vmem:[#allocation2 + $0x39] sm:$0xff] %v487_v4  ;;  %505 = vst [vmem:[#allocation2 + $0x49] sm:$0xff] %v488_v5 }
  0xcb   : > { %506 = vst [vmem:[#allocation2 + $0x51] sm:$0xff] %v489_v6  ;;  %507 = vst [vmem:[#allocation2 + $0x61] sm:$0xff] %v490_v7 }
  0xcc   : > { %508 = vst [vmem:[#allocation2 + $0x69] sm:$0xff] %v491_v8  ;;  %509 = vst [vmem:[#allocation2 + $0x79] sm:$0xff] %v492_v9  ;;  %520 = sbr.rel (%p2017_p11) target bundleno = 211 (0xd3), region = 56 }
  0xcd   : > { %510 = vst [vmem:[#allocation2 + $0x81] sm:$0xff] %v493_v10  ;;  %511 = vst [vmem:[#allocation2 + $0x91] sm:$0xff] %v494_v11 }
  0xce   : > { %512 = vst [vmem:[#allocation2 + $0x99] sm:$0xff] %v495_v12  ;;  %513 = vst [vmem:[#allocation2 + $0xa9] sm:$0xff] %v496_v13 }
  0xcf   : > { %514 = vst [vmem:[#allocation2 + $0xb1] sm:$0xff] %v497_v14  ;;  %515 = vst [vmem:[#allocation2 + $0xc1] sm:$0xff] %v498_v15 }
  0xd0   : > { %516 = vst [vmem:[#allocation2 + $0xc9] sm:$0xff] %v499_v16 }
  0xd1   : > { %v521_v17 = vld [vmem:[%s379_s12] sm:$0xff]  ;;  %v522_v18 = vld [vmem:[%s379_s12 + $0x8] sm:$0xff] }
  0xd2   : > { %523 = vst [vmem:[#allocation2 + $0x1] sm:$0xff] %v521_v17  ;;  %524 = vst [vmem:[#allocation2 + $0x9] sm:$0xff] %v522_v18 }
  0xd3 PF: > { %s4235_s9 = sld [smem:[#allocation28_spill]] }
  0xd9   : > { %p2018_p12 = scmp.ge.s32.totalorder %s4235_s9, 1 }
  0xdb   : > { %528 = sbr.rel (%p2018_p12) target bundleno = 226 (0xe2), region = 60 }
  0xe0   : > { %v529_v19 = vld [vmem:[%s388_s25] sm:$0xff]  ;;  %v530_v20 = vld [vmem:[%s388_s25 + $0x8] sm:$0xff] }
  0xe1   : > { %532 = vst [vmem:[#allocation2 + $0xd9] sm:$0xff] %v529_v19  ;;  %533 = vst [vmem:[#allocation2 + $0xe1] sm:$0xff] %v530_v20 }
  0xe2 PF: > { %v674_v21 = vld [vmem:[#allocation9 + $0x278] sm:$0xff]  ;;  %v673_v24 = vld [vmem:[#allocation9 + $0x270] sm:$0xff]  ;;  %v672_v27 = vld [vmem:[#allocation9 + $0x268] sm:$0xff]  ;;  %s4251_s24 = sld [smem:[#allocation29_spill]]  ;;  %s1743_s4 = sshll.u32 %s3478_s29, 4  ;;  %s3970_s4 = int_to_ptr.vmem [resolvable:$true] %s1743_s4 }
  0xe3   : > { %v690_v22 = vld [vmem:[#allocation9 + $0x2f8] sm:$0xff]  ;;  %2037 = vmatprep.subr.mxu0 %v674_v21  ;;  %v689_v25 = vld [vmem:[#allocation9 + $0x2f0] sm:$0xff]  ;;  %v688_v28 = vld [vmem:[#allocation9 + $0x2e8] sm:$0xff]  ;;  %s4256_s14 = sld [smem:[#allocation28_spill]]  ;;  %s1720_s30 = scalar_lea.sflag [#allocation5], %s3457_s2 }
  0xe4   : > { %v658_v23 = vld [vmem:[#allocation9 + $0x1f8] sm:$0xff]  ;;  %2373 = vmatprep.subr.mxu1 %v690_v22  ;;  %v657_v26 = vld [vmem:[#allocation9 + $0x1f0] sm:$0xff]  ;;  %v656_v29 = vld [vmem:[#allocation9 + $0x1e8] sm:$0xff]  ;;  %s4260_s27 = sld [smem:[#allocation55_spill]]  ;;  %s2837_s1 = scalar_lea.vmem %s3970_s4, 2048 }
  0xe5   : > { %2038 = vmatpush3.msra.mxu0 %v658_v23  ;;  %2374 = vmatpush3.msra.mxu1 %v690_v22  ;;  %v671_v30 = vld [vmem:[#allocation9 + $0x260] sm:$0xff]  ;;  %v670_v33 = vld [vmem:[#allocation9 + $0x258] sm:$0xff]  ;;  %v669_v36 = vld [vmem:[#allocation9 + $0x250] sm:$0xff]  ;;  %p2838_p4 = scmp.ne.s32.totalorder %s3970_s4, %s2837_s1  ;;  %p4262_p8 = scmp.ne.s32.totalorder %s4198_s17, 0 }
  0xe6   : > { %2039 = vmatprep.subr.mxu0 %v673_v24  ;;  %2375 = vmatprep.subr.mxu1 %v689_v25  ;;  %v687_v31 = vld [vmem:[#allocation9 + $0x2e0] sm:$0xff]  ;;  %v686_v34 = vld [vmem:[#allocation9 + $0x2d8] sm:$0xff]  ;;  %v685_v37 = vld [vmem:[#allocation9 + $0x2d0] sm:$0xff]  ;;  %s3082_s25 = smov [#allocation11]  }
  0xe7   : > { %2040 = vmatpush3.msra.mxu0 %v657_v26  ;;  %2376 = vmatpush3.msra.mxu1 %v689_v25  ;;  %v655_v32 = vld [vmem:[#allocation9 + $0x1e0] sm:$0xff]  ;;  %v654_v35 = vld [vmem:[#allocation9 + $0x1d8] sm:$0xff]  ;;  %v653_v38 = vld [vmem:[#allocation9 + $0x1d0] sm:$0xff]  ;;  %p2839_p9 = pnand %p2838_p4, %p4262_p8  ;;  %s2841_s10 = sshll.u32 %s3082_s25, 4  ;;  %s2842_s10 = int_to_ptr.vmem [resolvable:$false] %s2841_s10 }
  0xe8   : > { %2041 = vmatprep.subr.mxu0 %v672_v27  ;;  %2377 = vmatprep.subr.mxu1 %v688_v28  ;;  %v668_v39 = vld [vmem:[#allocation9 + $0x248] sm:$0xff]  ;;  %v667_v42 = vld [vmem:[#allocation9 + $0x240] sm:$0xff]  ;;  %v666_v45 = vld [vmem:[#allocation9 + $0x238] sm:$0xff]  ;;  %s2020_s20 = sshll.u32 %s4251_s24, 1  ;;  %s2843_s11 = scalar_lea.vmem %s2842_s10, 4096 }
  0xe9   : > { %2042 = vmatpush3.msra.mxu0 %v656_v29  ;;  %2378 = vmatpush3.msra.mxu1 %v688_v28  ;;  %v684_v40 = vld [vmem:[#allocation9 + $0x2c8] sm:$0xff]  ;;  %v683_v43 = vld [vmem:[#allocation9 + $0x2c0] sm:$0xff]  ;;  %v682_v46 = vld [vmem:[#allocation9 + $0x2b8] sm:$0xff]  ;;  %s3952_s16 = sadd.s32 %s4256_s14, %s2020_s20  ;;  %p2840_p10 = pneg %p2839_p9 }
  0xea   : > { %2043 = vmatprep.subr.mxu0 %v671_v30  ;;  %2379 = vmatprep.subr.mxu1 %v687_v31  ;;  %v652_v41 = vld [vmem:[#allocation9 + $0x1c8] sm:$0xff]  ;;  %v651_v44 = vld [vmem:[#allocation9 + $0x1c0] sm:$0xff]  ;;  %v650_v47 = vld [vmem:[#allocation9 + $0x1b8] sm:$0xff]  ;;  %s2036_s0 = sshll.u32 %s3952_s16, 11  ;;  %s4261_s6 = smov %s4260_s27 }
  0xeb   : > { %2044 = vmatpush3.msra.mxu0 %v655_v32  ;;  %2380 = vmatpush3.msra.mxu1 %v687_v31  ;;  %v665_v48 = vld [vmem:[#allocation9 + $0x230] sm:$0xff]  ;;  %v664_v51 = vld [vmem:[#allocation9 + $0x228] sm:$0xff]  ;;  %v663_v54 = vld [vmem:[#allocation9 + $0x220] sm:$0xff]  ;;  %s3968_s12 = scalar_lea.hbm %s4260_s27, %s2036_s0  ;;  %p2844_p2 = scmp.lt.s32.totalorder %s3970_s4, %s2842_s10 }
  0xec   : > { %2045 = vmatprep.subr.mxu0 %v670_v33  ;;  %2381 = vmatprep.subr.mxu1 %v686_v34  ;;  %v681_v49 = vld [vmem:[#allocation9 + $0x2b0] sm:$0xff]  ;;  %v680_v52 = vld [vmem:[#allocation9 + $0x2a8] sm:$0xff]  ;;  %v679_v55 = vld [vmem:[#allocation9 + $0x2a0] sm:$0xff]  ;;  %p2845_p0 = scmp.lt.s32.totalorder %s2843_s11, %s2837_s1 }
  0xed   : > { %2046 = vmatpush3.msra.mxu0 %v654_v35  ;;  %2382 = vmatpush3.msra.mxu1 %v686_v34  ;;  %v649_v50 = vld [vmem:[#allocation9 + $0x1b0] sm:$0xff]  ;;  %v648_v53 = vld [vmem:[#allocation9 + $0x1a8] sm:$0xff]  ;;  %v647_v56 = vld [vmem:[#allocation9 + $0x1a0] sm:$0xff] }
  0xee   : > { %2047 = vmatprep.subr.mxu0 %v669_v36  ;;  %2383 = vmatprep.subr.mxu1 %v685_v37  ;;  %v662_v57 = vld [vmem:[#allocation9 + $0x218] sm:$0xff]  ;;  %v661_v60 = vld [vmem:[#allocation9 + $0x210] sm:$0xff]  ;;  %v660_v63 = vld [vmem:[#allocation9 + $0x208] sm:$0xff]  ;;  %p2846_p5 = por %p2845_p0, %p2844_p2 }
  0xef   : > { %2048 = vmatpush3.msra.mxu0 %v653_v38  ;;  %2384 = vmatpush3.msra.mxu1 %v685_v37  ;;  %v678_v58 = vld [vmem:[#allocation9 + $0x298] sm:$0xff]  ;;  %v677_v61 = vld [vmem:[#allocation9 + $0x290] sm:$0xff]  ;;  %v676_v0 = vld [vmem:[#allocation9 + $0x288] sm:$0xff] }
  0xf0   : > { %2049 = vmatprep.subr.mxu0 %v668_v39  ;;  %2385 = vmatprep.subr.mxu1 %v684_v40  ;;  %v646_v59 = vld [vmem:[#allocation9 + $0x198] sm:$0xff]  ;;  %v645_v62 = vld [vmem:[#allocation9 + $0x190] sm:$0xff]  ;;  %v644_v1 = vld [vmem:[#allocation9 + $0x188] sm:$0xff]  ;;  %p2847_p1 = pnand %p2846_p5, %p2840_p10 }
  0xf1   : > { %2050 = vmatpush3.msra.mxu0 %v652_v41  ;;  %2386 = vmatpush3.msra.mxu1 %v684_v40  ;;  %v659_v2 = vld [vmem:[#allocation9 + $0x200] sm:$0xff]  ;;  %v3492_v5 = vld [vmem:[#allocation2 + $0x19] sm:$0xff]  ;;  %v3498_v8 = vld [vmem:[#allocation2 + $0x22] sm:$0xff] }
  0xf2   : > { %2051 = vmatprep.subr.mxu0 %v667_v42  ;;  %2387 = vmatprep.subr.mxu1 %v683_v43  ;;  %v675_v3 = vld [vmem:[#allocation9 + $0x280] sm:$0xff]  ;;  %v3494_v6 = vld [vmem:[#allocation2 + $0x1a] sm:$0xff]  ;;  %v625_v9 = vld [vmem:[#allocation9 + $0xf8] sm:$0xff] }
  0xf3   : > { %2052 = vmatpush3.msra.mxu0 %v651_v44  ;;  %2388 = vmatpush3.msra.mxu1 %v683_v43  ;;  %v643_v4 = vld [vmem:[#allocation9 + $0x180] sm:$0xff]  ;;  %v3496_v7 = vld [vmem:[#allocation2 + $0x18] sm:$0xff]  ;;  %v641_v10 = vld [vmem:[#allocation9 + $0x178] sm:$0xff] }
  0xf4   : > { %2053 = vmatprep.subr.mxu0 %v666_v45  ;;  %2389 = vmatprep.subr.mxu1 %v682_v46  ;;  %v609_v11 = vld [vmem:[#allocation9 + $0x78] sm:$0xff]  ;;  %v624_v12 = vld [vmem:[#allocation9 + $0xf0] sm:$0xff]  ;;  %v3506_v14 = vld [vmem:[#allocation2 + $0x32] sm:$0xff] }
  0xf5   : > { %2054 = vmatpush3.msra.mxu0 %v650_v47  ;;  %2390 = vmatpush3.msra.mxu1 %v682_v46  ;;  %v3504_v13 = vld [vmem:[#allocation2 + $0x21] sm:$0xff]  ;;  %v623_v18 = vld [vmem:[#allocation9 + $0xe8] sm:$0xff]  ;;  %v622_v21 = vld [vmem:[#allocation9 + $0xe0] sm:$0xff] }
  0xf6   : > { %2055 = vmatprep.subr.mxu0 %v665_v48  ;;  %2391 = vmatprep.subr.mxu1 %v681_v49  ;;  %v608_v15 = vld [vmem:[#allocation9 + $0x70] sm:$0xff]  ;;  %v607_v20 = vld [vmem:[#allocation9 + $0x68] sm:$0xff]  ;;  %v3518_v23 = vld [vmem:[#allocation2 + $0x4a] sm:$0xff] }
  0xf7   : > { %2056 = vmatpush3.msra.mxu0 %v649_v50  ;;  %2392 = vmatpush3.msra.mxu1 %v681_v49  ;;  %v3508_v16 = vld [vmem:[#allocation2 + $0x20] sm:$0xff]  ;;  %v3516_v22 = vld [vmem:[#allocation2 + $0x31] sm:$0xff]  ;;  %v621_v27 = vld [vmem:[#allocation9 + $0xd8] sm:$0xff] }
  0xf8   : > { %2057 = vmatprep.subr.mxu0 %v664_v51  ;;  %2393 = vmatprep.subr.mxu1 %v680_v52  ;;  %v3510_v17 = vld [vmem:[#allocation2 + $0x3a] sm:$0xff]  ;;  %v606_v24 = vld [vmem:[#allocation9 + $0x60] sm:$0xff]  ;;  %v605_v29 = vld [vmem:[#allocation9 + $0x58] sm:$0xff] }
  0xf9   : > { %2058 = vmatpush3.msra.mxu0 %v648_v53  ;;  %2394 = vmatpush3.msra.mxu1 %v680_v52  ;;  %v640_v19 = vld [vmem:[#allocation9 + $0x170] sm:$0xff]  ;;  %v3520_v25 = vld [vmem:[#allocation2 + $0x30] sm:$0xff]  ;;  %v639_v28 = vld [vmem:[#allocation9 + $0x168] sm:$0xff] }
  0xfa   : > { %2059 = vmatprep.subr.mxu0 %v663_v54  ;;  %2395 = vmatprep.subr.mxu1 %v679_v55  ;;  %v3522_v26 = vld [vmem:[#allocation2 + $0x52] sm:$0xff]  ;;  %v620_v30 = vld [vmem:[#allocation9 + $0xd0] sm:$0xff]  ;;  %v3534_v35 = vld [vmem:[#allocation2 + $0x6a] sm:$0xff] }
  0xfb   : > { %2060 = vmatpush3.msra.mxu0 %v647_v56  ;;  %2396 = vmatpush3.msra.mxu1 %v679_v55  ;;  %v3528_v31 = vld [vmem:[#allocation2 + $0x39] sm:$0xff]  ;;  %v3530_v32 = vld [vmem:[#allocation2 + $0x62] sm:$0xff]  ;;  %v638_v37 = vld [vmem:[#allocation9 + $0x160] sm:$0xff] }
  0xfc   : > { %2061 = vmatprep.subr.mxu0 %v662_v57  ;;  %2397 = vmatprep.subr.mxu1 %v678_v58  ;;  %v604_v33 = vld [vmem:[#allocation9 + $0x50] sm:$0xff]  ;;  %v3532_v34 = vld [vmem:[#allocation2 + $0x38] sm:$0xff]  ;;  %v618_v39 = vld [vmem:[#allocation9 + $0xc0] sm:$0xff] }
  0xfd   : > { %2062 = vmatpush3.msra.mxu0 %v646_v59  ;;  %2398 = vmatpush3.msra.mxu1 %v678_v58  ;;  %v619_v36 = vld [vmem:[#allocation9 + $0xc8] sm:$0xff]  ;;  %v3540_v40 = vld [vmem:[#allocation2 + $0x49] sm:$0xff]  ;;  %v616_v48 = vld [vmem:[#allocation9 + $0xb0] sm:$0xff] }
  0xfe   : > { %2063 = vmatprep.subr.mxu0 %v661_v60  ;;  %2399 = vmatprep.subr.mxu1 %v677_v61  ;;  %v603_v38 = vld [vmem:[#allocation9 + $0x48] sm:$0xff]  ;;  %v602_v42 = vld [vmem:[#allocation9 + $0x40] sm:$0xff]  ;;  %v3544_v43 = vld [vmem:[#allocation2 + $0x48] sm:$0xff] }
  0xff   : > { %2064 = vmatpush3.msra.mxu0 %v645_v62  ;;  %2400 = vmatpush3.msra.mxu1 %v677_v61  ;;  %v3542_v41 = vld [vmem:[#allocation2 + $0x7a] sm:$0xff]  ;;  %v3546_v44 = vld [vmem:[#allocation2 + $0x82] sm:$0xff]  ;;  %v3552_v49 = vld [vmem:[#allocation2 + $0x51] sm:$0xff] }
 0x100   : > { %2065 = vmatprep.subr.mxu0 %v660_v63  ;;  %2401 = vmatprep.subr.mxu1 %v676_v0  ;;  %v617_v45 = vld [vmem:[#allocation9 + $0xb8] sm:$0xff]  ;;  %v3554_v50 = vld [vmem:[#allocation2 + $0x92] sm:$0xff]  ;;  %v600_v51 = vld [vmem:[#allocation9 + $0x30] sm:$0xff] }
 0x101   : > { %2066 = vmatpush3.msra.mxu0 %v644_v1  ;;  %2402 = vmatpush3.msra.mxu1 %v676_v0  ;;  %v637_v46 = vld [vmem:[#allocation9 + $0x158] sm:$0xff]  ;;  %v3556_v52 = vld [vmem:[#allocation2 + $0x50] sm:$0xff]  ;;  %v3558_v53 = vld [vmem:[#allocation2 + $0x9a] sm:$0xff] }
 0x102   : > { %2067 = vmatprep.subr.mxu0 %v659_v2  ;;  %2403 = vmatprep.subr.mxu1 %v675_v3  ;;  %v601_v47 = vld [vmem:[#allocation9 + $0x38] sm:$0xff]  ;;  %v615_v54 = vld [vmem:[#allocation9 + $0xa8] sm:$0xff]  ;;  %v636_v55 = vld [vmem:[#allocation9 + $0x150] sm:$0xff] }
 0x103   : > { %2068 = vmatpush3.msra.mxu0 %v643_v4  ;;  %755 = vmatprep.mubr.f32.mxu0 %v3492_v5  ;;  %v599_v56 = vld [vmem:[#allocation9 + $0x28] sm:$0xff]  ;;  %v614_v57 = vld [vmem:[#allocation9 + $0xa0] sm:$0xff]  ;;  %v3564_v58 = vld [vmem:[#allocation2 + $0x61] sm:$0xff] }
 0x104   : > { %2404 = vmatpush3.msra.mxu1 %v675_v3  ;;  %2405 = vmatprep.mubr.f32.mxu1 %v3494_v6  ;;  %v3566_v59 = vld [vmem:[#allocation2 + $0xaa] sm:$0xff]  ;;  %v3568_v61 = vld [vmem:[#allocation2 + $0x60] sm:$0xff]  ;;  %v3570_v62 = vld [vmem:[#allocation2 + $0xb2] sm:$0xff] }
 0x105   : > { %756 = vmatmul.mubr.f32.vlgmr.msra.gmra.mxu0 %v3496_v7  ;;  %2406 = vmatmul.mubr.f32.vlgmr.msra.gmra.mxu1 %v3498_v8  ;;  %v598_v60 = vld [vmem:[#allocation9 + $0x20] sm:$0xff]  ;;  %v613_v63 = vld [vmem:[#allocation9 + $0x98] sm:$0xff]  ;;  %v635_v0 = vld [vmem:[#allocation9 + $0x148] sm:$0xff] }
 0x106   : > { %2149 = vmatprep.subr.mxu1 %v625_v9  ;;  %2429 = vmatprep.subr.mxu0 %v641_v10  ;;  %v597_v1 = vld [vmem:[#allocation9 + $0x18] sm:$0xff]  ;;  %v612_v2 = vld [vmem:[#allocation9 + $0x90] sm:$0xff] }
 0x107   : > { %2150 = vmatpush3.msra.mxu1 %v609_v11  ;;  %2430 = vmatpush3.msra.mxu0 %v641_v10  ;;  %v3576_v3 = vld [vmem:[#allocation2 + $0x69] sm:$0xff]  ;;  %v596_v9 = vld [vmem:[#allocation9 + $0x10] sm:$0xff] }
 0x108   : > { %2151 = vmatprep.subr.mxu1 %v624_v12  ;;  %760 = vmatprep.mubr.f32.mxu0 %v3504_v13  ;;  %v3578_v4 = vld [vmem:[#allocation2 + $0xc2] sm:$0xff]  ;;  %v3582_v11 = vld [vmem:[#allocation2 + $0xca] sm:$0xff]  ;;  %v611_v12 = vld [vmem:[#allocation9 + $0x88] sm:$0xff] }
 0x109   : > { %2408 = vmatprep.mubr.f32.mxu1 %v3506_v14  ;;  %2152 = vmatpush3.msra.mxu1 %v608_v15  ;;  %v3580_v10 = vld [vmem:[#allocation2 + $0x68] sm:$0xff]  ;;  %v634_v15 = vld [vmem:[#allocation9 + $0x140] sm:$0xff] }
 0x10a   : > { %761 = vmatmul.mubr.f32.gmra.mxu0 %v3508_v16  ;;  %2409 = vmatmul.mubr.f32.gmra.mxu1 %v3510_v17 }
 0x10b   : > { %2153 = vmatprep.subr.mxu1 %v623_v18  ;;  %2431 = vmatprep.subr.mxu0 %v640_v19  ;;  %v595_v18 = vld [vmem:[#allocation9 + $0x8] sm:$0xff] }
 0x10c   : > { %2154 = vmatpush3.msra.mxu1 %v607_v20  ;;  %2432 = vmatpush3.msra.mxu0 %v640_v19  ;;  %v610_v19 = vld [vmem:[#allocation9 + $0x80] sm:$0xff]  ;;  %v3588_v20 = vld [vmem:[#allocation2 + $0x79] sm:$0xff] }
 0x10d   : > { %2155 = vmatprep.subr.mxu1 %v622_v21  ;;  %765 = vmatprep.mubr.f32.mxu0 %v3516_v22  ;;  %v594_v21 = vld [vmem:[#allocation9] sm:$0xff] }
 0x10e   : > { %2411 = vmatprep.mubr.f32.mxu1 %v3518_v23  ;;  %2156 = vmatpush3.msra.mxu1 %v606_v24  ;;  %v554_v24 = vld [vmem:[#allocation2 + $0x1] sm:$0xff] }
 0x10f   : > { %766 = vmatmul.mubr.f32.gmra.mxu0 %v3520_v25  ;;  %2412 = vmatmul.mubr.f32.gmra.mxu1 %v3522_v26 }
 0x110   : > { %2157 = vmatprep.subr.mxu1 %v621_v27  ;;  %2433 = vmatprep.subr.mxu0 %v639_v28  ;;  %v3590_v27 = vld [vmem:[#allocation2 + $0x78] sm:$0xff] }
 0x111   : > { %2158 = vmatpush3.msra.mxu1 %v605_v29  ;;  %2434 = vmatpush3.msra.mxu0 %v639_v28  ;;  %v534_v28 = vld [vmem:[#allocation2] sm:$0xff]  ;;  %v633_v29 = vld [vmem:[#allocation9 + $0x138] sm:$0xff] }
 0x112   : > { %2159 = vmatprep.subr.mxu1 %v620_v30  ;;  %770 = vmatprep.mubr.f32.mxu0 %v3528_v31  ;;  %v3593_v30 = vld [vmem:[#allocation2 + $0x81] sm:$0xff] }
 0x113   : > { %2414 = vmatprep.mubr.f32.mxu1 %v3530_v32  ;;  %2160 = vmatpush3.msra.mxu1 %v604_v33  ;;  %v555_v33 = vld [vmem:[#allocation2 + $0x9] sm:$0xff] }
 0x114   : > { %771 = vmatmul.mubr.f32.gmra.mxu0 %v3532_v34  ;;  %2415 = vmatmul.mubr.f32.gmra.mxu1 %v3534_v35 }
 0x115   : > { %2161 = vmatprep.subr.mxu1 %v619_v36  ;;  %2435 = vmatprep.subr.mxu0 %v638_v37  ;;  %v632_v36 = vld [vmem:[#allocation9 + $0x130] sm:$0xff] }
 0x116   : > { %2162 = vmatpush3.msra.mxu1 %v603_v38  ;;  %2436 = vmatpush3.msra.mxu0 %v638_v37  ;;  %v1319_v37 = vld [vmem:[#allocation9 + $0x478] sm:$0xff]  ;;  %v3597_v38 = vld [vmem:[#allocation2 + $0x80] sm:$0xff] }
 0x117   : > { %2163 = vmatprep.subr.mxu1 %v618_v39  ;;  %775 = vmatprep.mubr.f32.mxu0 %v3540_v40  ;;  %v535_v39 = vld [vmem:[#allocation2 + $0x8] sm:$0xff] }
 0x118   : > { %2417 = vmatprep.mubr.f32.mxu1 %v3542_v41  ;;  %2164 = vmatpush3.msra.mxu1 %v602_v42  ;;  %v3599_v42 = vld [vmem:[#allocation2 + $0x91] sm:$0xff] }
 0x119   : > { %776 = vmatmul.mubr.f32.gmra.mxu0 %v3544_v43  ;;  %2418 = vmatmul.mubr.f32.gmra.mxu1 %v3546_v44 }
 0x11a   : > { %2165 = vmatprep.subr.mxu1 %v617_v45  ;;  %2437 = vmatprep.subr.mxu0 %v637_v46  ;;  %v631_v45 = vld [vmem:[#allocation9 + $0x128] sm:$0xff] }
 0x11b   : > { %2166 = vmatpush3.msra.mxu1 %v601_v47  ;;  %2438 = vmatpush3.msra.mxu0 %v637_v46  ;;  %v3603_v46 = vld [vmem:[#allocation2 + $0x90] sm:$0xff]  ;;  %v3606_v47 = vld [vmem:[#allocation2 + $0x99] sm:$0xff] }
 0x11c   : > { %2167 = vmatprep.subr.mxu1 %v616_v48  ;;  %780 = vmatprep.mubr.f32.mxu0 %v3552_v49  ;;  %v630_v48 = vld [vmem:[#allocation9 + $0x120] sm:$0xff] }
 0x11d   : > { %2420 = vmatprep.mubr.f32.mxu1 %v3554_v50  ;;  %2168 = vmatpush3.msra.mxu1 %v600_v51  ;;  %v1318_v51 = vld [vmem:[#allocation9 + $0x470] sm:$0xff] }
 0x11e   : > { %781 = vmatmul.mubr.f32.gmra.mxu0 %v3556_v52  ;;  %2421 = vmatmul.mubr.f32.gmra.mxu1 %v3558_v53 }
 0x11f   : > { %2169 = vmatprep.subr.mxu1 %v615_v54  ;;  %2439 = vmatprep.subr.mxu0 %v636_v55  ;;  %v3612_v54 = vld [vmem:[#allocation2 + $0x98] sm:$0xff] }
 0x120   : > { %2170 = vmatpush3.msra.mxu1 %v599_v56  ;;  %2440 = vmatpush3.msra.mxu0 %v636_v55  ;;  %v3614_v55 = vld [vmem:[#allocation2 + $0xa9] sm:$0xff]  ;;  %v1317_v56 = vld [vmem:[#allocation9 + $0x468] sm:$0xff] }
 0x121   : > { %2171 = vmatprep.subr.mxu1 %v614_v57  ;;  %785 = vmatprep.mubr.f32.mxu0 %v3564_v58  ;;  %v628_v57 = vld [vmem:[#allocation9 + $0x110] sm:$0xff] }
 0x122   : > { %2423 = vmatprep.mubr.f32.mxu1 %v3566_v59  ;;  %2172 = vmatpush3.msra.mxu1 %v598_v60  ;;  %v1316_v60 = vld [vmem:[#allocation9 + $0x460] sm:$0xff] }
 0x123   : > { %786 = vmatmul.mubr.f32.gmra.mxu0 %v3568_v61  ;;  %2424 = vmatmul.mubr.f32.gmra.mxu1 %v3570_v62 }
 0x124   : > { %2173 = vmatprep.subr.mxu1 %v613_v63  ;;  %2441 = vmatprep.subr.mxu0 %v635_v0  ;;  %v3630_v63 = vld [vmem:[#allocation2 + $0xc1] sm:$0xff] }
 0x125   : > { %2174 = vmatpush3.msra.mxu1 %v597_v1  ;;  %2442 = vmatpush3.msra.mxu0 %v635_v0  ;;  %v627_v0 = vld [vmem:[#allocation9 + $0x108] sm:$0xff]  ;;  %v1315_v1 = vld [vmem:[#allocation9 + $0x458] sm:$0xff] }
 0x126   : > { %2175 = vmatprep.subr.mxu1 %v612_v2  ;;  %790 = vmatprep.mubr.f32.mxu0 %v3576_v3  ;;  %v3636_v2 = vld [vmem:[#allocation2 + $0xc0] sm:$0xff] }
 0x127   : > { %2426 = vmatprep.mubr.f32.mxu1 %v3578_v4  ;;  %2176 = vmatpush3.msra.mxu1 %v596_v9  ;;  %v3638_v9 = vld [vmem:[#allocation2 + $0xc9] sm:$0xff] }
 0x128   : > { %791 = vmatmul.mubr.f32.gmra.mxu0 %v3580_v10  ;;  %2427 = vmatmul.mubr.f32.gmra.mxu1 %v3582_v11 }
 0x129   : > { %2177 = vmatprep.subr.mxu1 %v611_v12  ;;  %2443 = vmatprep.subr.mxu0 %v634_v15  ;;  %v626_v12 = vld [vmem:[#allocation9 + $0x100] sm:$0xff] }
 0x12a   : > { %2178 = vmatpush3.msra.mxu1 %v595_v18  ;;  %2444 = vmatpush3.msra.mxu0 %v634_v15  ;;  %v1314_v15 = vld [vmem:[#allocation9 + $0x450] sm:$0xff]  ;;  %v3644_v18 = vld [vmem:[#allocation2 + $0xc8] sm:$0xff] }
 0x12b   : > { %2179 = vmatprep.subr.mxu1 %v610_v19  ;;  %795 = vmatprep.mubr.f32.mxu0 %v3588_v20  ;;  %v574_v19 = vld [vmem:[#allocation2 + $0x2] sm:$0xff] }
 0x12c   : > { %2180 = vmatpush3.msra.mxu1 %v594_v21  ;;  %1045 = vmatprep.mubr.f32.mxu1 %v554_v24  ;;  %v1303_v21 = vld [vmem:[#allocation9 + $0x3f8] sm:$0xff]  ;;  %v1313_v24 = vld [vmem:[#allocation9 + $0x448] sm:$0xff] }
 0x12d   : > { %796 = vmatmul.mubr.f32.gmra.mxu0 %v3590_v27  ;;  %1046 = vmatmul.mubr.f32.vlgmr.msra.gmra.mxu1 %v534_v28  ;;  %v575_v28 = vld [vmem:[#allocation2 + $0xa] sm:$0xff] }
 0x12e   : > { %2445 = vmatprep.subr.mxu0 %v633_v29  ;;  %800 = vmatprep.mubr.f32.mxu0 %v3593_v30 }
 0x12f   : > { %2446 = vmatpush3.msra.mxu0 %v633_v29  ;;  %1050 = vmatprep.mubr.f32.mxu1 %v555_v33  ;;  %v1287_v29 = vld [vmem:[#allocation9 + $0x378] sm:$0xff]  ;;  %v1302_v33 = vld [vmem:[#allocation9 + $0x3f0] sm:$0xff] }
 0x130   : > { %2447 = vmatprep.subr.mxu0 %v632_v36  ;;  %2485 = vmatprep.subr.mxu1 %v1319_v37 }
 0x131   : > { %801 = vmatmul.mubr.f32.gmra.mxu0 %v3597_v38  ;;  %1051 = vmatmul.mubr.f32.gmra.mxu1 %v535_v39  ;;  %v1301_v39 = vld [vmem:[#allocation9 + $0x3e8] sm:$0xff] }
 0x132   : > { %2448 = vmatpush3.msra.mxu0 %v632_v36  ;;  %805 = vmatprep.mubr.f32.mxu0 %v3599_v42  ;;  %v1286_v36 = vld [vmem:[#allocation9 + $0x370] sm:$0xff] }
 0x133   : > { %1055 = vmatprep.mubr.f32.mxu1 %v3492_v5  ;;  %2449 = vmatprep.subr.mxu0 %v631_v45  ;;  %v629_v5 = vld [vmem:[#allocation9 + $0x118] sm:$0xff] }
 0x134   : > { %2450 = vmatpush3.msra.mxu0 %v631_v45  ;;  %2486 = vmatpush3.msra.mxu1 %v1319_v37  ;;  %v1312_v37 = vld [vmem:[#allocation9 + $0x440] sm:$0xff]  ;;  %v1285_v45 = vld [vmem:[#allocation9 + $0x368] sm:$0xff] }
 0x135   : > { %806 = vmatmul.mubr.f32.gmra.mxu0 %v3603_v46  ;;  %1056 = vmatmul.mubr.f32.gmra.mxu1 %v3496_v7  ;;  %v3620_v7 = vld [vmem:[#allocation2 + $0xa8] sm:$0xff] }
 0x136   : > { %810 = vmatprep.mubr.f32.mxu0 %v3606_v47  ;;  %1060 = vmatprep.mubr.f32.mxu1 %v3504_v13  ;;  %v3622_v13 = vld [vmem:[#allocation2 + $0xb1] sm:$0xff] }
 0x137   : > { %2451 = vmatprep.subr.mxu0 %v630_v48  ;;  %2487 = vmatprep.subr.mxu1 %v1318_v51 }
 0x138   : > { %2452 = vmatpush3.msra.mxu0 %v630_v48  ;;  %2488 = vmatpush3.msra.mxu1 %v1318_v51  ;;  %v1300_v48 = vld [vmem:[#allocation9 + $0x3e0] sm:$0xff] }
 0x139   : > { %811 = vmatmul.mubr.f32.gmra.mxu0 %v3612_v54  ;;  %1061 = vmatmul.mubr.f32.gmra.mxu1 %v3508_v16  ;;  %v3628_v16 = vld [vmem:[#allocation2 + $0xb0] sm:$0xff] }
 0x13a   : > { %815 = vmatprep.mubr.f32.mxu0 %v3614_v55  ;;  %1065 = vmatprep.mubr.f32.mxu1 %v3516_v22  ;;  %v1284_v51 = vld [vmem:[#allocation9 + $0x360] sm:$0xff] }
 0x13b   : > { %2453 = vmatprep.subr.mxu0 %v629_v5  ;;  %2489 = vmatprep.subr.mxu1 %v1317_v56 }
 0x13c   : > { %2454 = vmatpush3.msra.mxu0 %v629_v5  ;;  %2490 = vmatpush3.msra.mxu1 %v1317_v56  ;;  %v1299_v5 = vld [vmem:[#allocation9 + $0x3d8] sm:$0xff] }
 0x13d   : > { %816 = vmatmul.mubr.f32.gmra.mxu0 %v3620_v7  ;;  %1066 = vmatmul.mubr.f32.gmra.mxu1 %v3520_v25  ;;  %v1283_v56 = vld [vmem:[#allocation9 + $0x358] sm:$0xff] }
 0x13e   : > { %820 = vmatprep.mubr.f32.mxu0 %v3622_v13  ;;  %1070 = vmatprep.mubr.f32.mxu1 %v3528_v31 }
 0x13f   : > { %2455 = vmatprep.subr.mxu0 %v628_v57  ;;  %2491 = vmatprep.subr.mxu1 %v1316_v60 }
 0x140   : > { %2456 = vmatpush3.msra.mxu0 %v628_v57  ;;  %2492 = vmatpush3.msra.mxu1 %v1316_v60  ;;  %v1297_v57 = vld [vmem:[#allocation9 + $0x3c8] sm:$0xff] }
 0x141   : > { %821 = vmatmul.mubr.f32.gmra.mxu0 %v3628_v16  ;;  %1071 = vmatmul.mubr.f32.gmra.mxu1 %v3532_v34  ;;  %v1281_v60 = vld [vmem:[#allocation9 + $0x348] sm:$0xff] }
 0x142   : > { %825 = vmatprep.mubr.f32.mxu0 %v3630_v63  ;;  %1075 = vmatprep.mubr.f32.mxu1 %v3540_v40 }
 0x143   : > { %2457 = vmatprep.subr.mxu0 %v627_v0  ;;  %2493 = vmatprep.subr.mxu1 %v1315_v1 }
 0x144   : > { %2458 = vmatpush3.msra.mxu0 %v627_v0  ;;  %2494 = vmatpush3.msra.mxu1 %v1315_v1  ;;  %v1296_v0 = vld [vmem:[#allocation9 + $0x3c0] sm:$0xff] }
 0x145   : > { %826 = vmatmul.mubr.f32.gmra.mxu0 %v3636_v2  ;;  %1076 = vmatmul.mubr.f32.gmra.mxu1 %v3544_v43  ;;  %v1280_v1 = vld [vmem:[#allocation9 + $0x340] sm:$0xff] }
 0x146   : > { %830 = vmatprep.mubr.f32.mxu0 %v3638_v9  ;;  %1080 = vmatprep.mubr.f32.mxu1 %v3552_v49 }
 0x147   : > { %2459 = vmatprep.subr.mxu0 %v626_v12  ;;  %2495 = vmatprep.subr.mxu1 %v1314_v15 }
 0x148   : > { %2460 = vmatpush3.msra.mxu0 %v626_v12  ;;  %2496 = vmatpush3.msra.mxu1 %v1314_v15  ;;  %v1295_v12 = vld [vmem:[#allocation9 + $0x3b8] sm:$0xff] }
 0x149   : > { %831 = vmatmul.mubr.f32.gmra.mxu0 %v3644_v18  ;;  %1081 = vmatmul.mubr.f32.gmra.mxu1 %v3556_v52  ;;  %v1279_v15 = vld [vmem:[#allocation9 + $0x338] sm:$0xff] }
 0x14a   : > { %1085 = vmatprep.mubr.f32.mxu1 %v3564_v58  ;;  %2461 = vmatprep.mubr.f32.mxu0 %v574_v19  ;;  %v1311_v19 = vld [vmem:[#allocation9 + $0x438] sm:$0xff] }
 0x14b   : > { %2261 = vmatprep.subr.mxu0 %v1303_v21  ;;  %2497 = vmatprep.subr.mxu1 %v1313_v24  ;;  %v1294_v21 = vld [vmem:[#allocation9 + $0x3b0] sm:$0xff] }
 0x14c   : > { %2498 = vmatpush3.msra.mxu1 %v1313_v24  ;;  %v1278_v24 = vld [vmem:[#allocation9 + $0x330] sm:$0xff] }
 0x14d   : > { %1086 = vmatmul.mubr.f32.gmra.mxu1 %v3568_v61  ;;  %2462 = vmatmul.mubr.f32.vlgmr.msra.gmra.mxu0 %v575_v28  ;;  %v1293_v28 = vld [vmem:[#allocation9 + $0x3a8] sm:$0xff] }
 0x14e   : > { %2262 = vmatpush3.msra.mxu0 %v1287_v29  ;;  %1090 = vmatprep.mubr.f32.mxu1 %v3576_v3  ;;  %v1310_v29 = vld [vmem:[#allocation9 + $0x430] sm:$0xff] }
 0x14f   : > { %2263 = vmatprep.subr.mxu0 %v1302_v33  ;;  %2464 = vmatprep.mubr.f32.mxu0 %v3494_v6  ;;  %v1298_v6 = vld [vmem:[#allocation9 + $0x3d0] sm:$0xff]  ;;  %v1277_v33 = vld [vmem:[#allocation9 + $0x328] sm:$0xff] }
 0x150   : > { %2264 = vmatpush3.msra.mxu0 %v1286_v36  ;;  %2499 = vmatprep.subr.mxu1 %v1312_v37  ;;  %v1292_v36 = vld [vmem:[#allocation9 + $0x3a0] sm:$0xff] }
 0x151   : > { %1091 = vmatmul.mubr.f32.gmra.mxu1 %v3580_v10  ;;  %2465 = vmatmul.mubr.f32.gmra.mxu0 %v3498_v8  ;;  %v1282_v8 = vld [vmem:[#allocation9 + $0x350] sm:$0xff] }
 0x152   : > { %2265 = vmatprep.subr.mxu0 %v1301_v39  ;;  %1095 = vmatprep.mubr.f32.mxu1 %v3588_v20  ;;  %v1276_v39 = vld [vmem:[#allocation9 + $0x320] sm:$0xff] }
 0x153   : > { %2266 = vmatpush3.msra.mxu0 %v1285_v45  ;;  %2467 = vmatprep.mubr.f32.mxu0 %v3506_v14  ;;  %v1291_v45 = vld [vmem:[#allocation9 + $0x398] sm:$0xff] }
 0x154   : > { %2267 = vmatprep.subr.mxu0 %v1300_v48  ;;  %2500 = vmatpush3.msra.mxu1 %v1312_v37  ;;  %v1309_v37 = vld [vmem:[#allocation9 + $0x428] sm:$0xff]  ;;  %v1308_v48 = vld [vmem:[#allocation9 + $0x420] sm:$0xff] }
 0x155   : > { %2268 = vmatpush3.msra.mxu0 %v1284_v51  ;;  %1096 = vmatmul.mubr.f32.gmra.mxu1 %v3590_v27  ;;  %v1275_v51 = vld [vmem:[#allocation9 + $0x318] sm:$0xff] }
 0x156   : > { %2468 = vmatmul.mubr.f32.gmra.mxu0 %v3510_v17  ;;  %2269 = vmatprep.subr.mxu0 %v1299_v5  ;;  %v1290_v5 = vld [vmem:[#allocation9 + $0x390] sm:$0xff] }
 0x157   : > { %2270 = vmatpush3.msra.mxu0 %v1283_v56  ;;  %1100 = vmatprep.mubr.f32.mxu1 %v3593_v30  ;;  %v1307_v56 = vld [vmem:[#allocation9 + $0x418] sm:$0xff] }
 0x158   : > { %2271 = vmatprep.subr.mxu0 %v1298_v6  ;;  %2470 = vmatprep.mubr.f32.mxu0 %v3518_v23  ;;  %v1274_v6 = vld [vmem:[#allocation9 + $0x310] sm:$0xff] }
 0x159   : > { %2272 = vmatpush3.msra.mxu0 %v1282_v8  ;;  %1101 = vmatmul.mubr.f32.gmra.mxu1 %v3597_v38  ;;  %v1289_v8 = vld [vmem:[#allocation9 + $0x388] sm:$0xff] }
 0x15a   : > { %2471 = vmatmul.mubr.f32.gmra.mxu0 %v3522_v26  ;;  %2273 = vmatprep.subr.mxu0 %v1297_v57  ;;  %v1306_v57 = vld [vmem:[#allocation9 + $0x410] sm:$0xff] }
 0x15b   : > { %2274 = vmatpush3.msra.mxu0 %v1281_v60  ;;  %1105 = vmatprep.mubr.f32.mxu1 %v3599_v42  ;;  %v1273_v60 = vld [vmem:[#allocation9 + $0x308] sm:$0xff] }
 0x15c   : > { %2275 = vmatprep.subr.mxu0 %v1296_v0  ;;  %2473 = vmatprep.mubr.f32.mxu0 %v3530_v32  ;;  %v1288_v0 = vld [vmem:[#allocation9 + $0x380] sm:$0xff] }
 0x15d   : > { %2276 = vmatpush3.msra.mxu0 %v1280_v1  ;;  %1106 = vmatmul.mubr.f32.gmra.mxu1 %v3603_v46  ;;  %v1305_v1 = vld [vmem:[#allocation9 + $0x408] sm:$0xff] }
 0x15e   : > { %2474 = vmatmul.mubr.f32.gmra.mxu0 %v3534_v35  ;;  %2277 = vmatprep.subr.mxu0 %v1295_v12  ;;  %v1272_v12 = vld [vmem:[#allocation9 + $0x300] sm:$0xff] }
 0x15f   : > { %2278 = vmatpush3.msra.mxu0 %v1279_v15  ;;  %2501 = vmatprep.subr.mxu1 %v1311_v19  ;;  %v1304_v15 = vld [vmem:[#allocation9 + $0x400] sm:$0xff] }
 0x160   : > { %2279 = vmatprep.subr.mxu0 %v1294_v21  ;;  %1110 = vmatprep.mubr.f32.mxu1 %v3606_v47 }
 0x161   : > { %2476 = vmatprep.mubr.f32.mxu0 %v3542_v41  ;;  %2280 = vmatpush3.msra.mxu0 %v1278_v24 }
 0x162   : > { %2502 = vmatpush3.msra.mxu1 %v1311_v19  ;;  %2477 = vmatmul.mubr.f32.gmra.mxu0 %v3546_v44 }
 0x163   : > { %1111 = vmatmul.mubr.f32.gmra.mxu1 %v3612_v54  ;;  %2281 = vmatprep.subr.mxu0 %v1293_v28 }
 0x164   : > { %2503 = vmatprep.subr.mxu1 %v1310_v29  ;;  %2282 = vmatpush3.msra.mxu0 %v1277_v33 }
 0x165   : > { %2504 = vmatpush3.msra.mxu1 %v1310_v29  ;;  %2283 = vmatprep.subr.mxu0 %v1292_v36 }
 0x166   : > { %2505 = vmatprep.subr.mxu1 %v1309_v37  ;;  %1115 = vmatprep.mubr.f32.mxu1 %v3614_v55 }
 0x167   : > { %2479 = vmatprep.mubr.f32.mxu0 %v3554_v50  ;;  %2284 = vmatpush3.msra.mxu0 %v1276_v39 }
 0x168   : > { %2506 = vmatpush3.msra.mxu1 %v1309_v37  ;;  %2480 = vmatmul.mubr.f32.gmra.mxu0 %v3558_v53 }
 0x169   : > { %1116 = vmatmul.mubr.f32.gmra.mxu1 %v3620_v7  ;;  %2285 = vmatprep.subr.mxu0 %v1291_v45 }
 0x16a   : > { %2507 = vmatprep.subr.mxu1 %v1308_v48  ;;  %2286 = vmatpush3.msra.mxu0 %v1275_v51 }
 0x16b   : > { %2508 = vmatpush3.msra.mxu1 %v1308_v48  ;;  %2287 = vmatprep.subr.mxu0 %v1290_v5 }
 0x16c   : > { %2509 = vmatprep.subr.mxu1 %v1307_v56  ;;  %1120 = vmatprep.mubr.f32.mxu1 %v3622_v13 }
 0x16d   : > { %2482 = vmatprep.mubr.f32.mxu0 %v3566_v59  ;;  %2288 = vmatpush3.msra.mxu0 %v1274_v6 }
 0x16e   : > { %2510 = vmatpush3.msra.mxu1 %v1307_v56  ;;  %2483 = vmatmul.mubr.f32.gmra.mxu0 %v3570_v62 }
 0x16f   : > { %1121 = vmatmul.mubr.f32.gmra.mxu1 %v3628_v16  ;;  %2289 = vmatprep.subr.mxu0 %v1289_v8 }
 0x170   : > { %2511 = vmatprep.subr.mxu1 %v1306_v57  ;;  %2290 = vmatpush3.msra.mxu0 %v1273_v60 }
 0x171   : > { %2512 = vmatpush3.msra.mxu1 %v1306_v57  ;;  %2291 = vmatprep.subr.mxu0 %v1288_v0 }
 0x172   : > { %2513 = vmatprep.subr.mxu1 %v1305_v1  ;;  %2292 = vmatpush3.msra.mxu0 %v1272_v12 }
 0x173   : > { %1384 = vmatprep.mubr.f32.mxu0 %v3516_v22  ;;  %2514 = vmatpush3.msra.mxu1 %v1305_v1  ;;  %v572_v22 = vld [vmem:[#allocation2 + $0xd9] sm:$0xff] }
 0x174   : > { %1385 = vmatmul.mubr.f32.vlgmr.msra.gmra.mxu0 %v3520_v25  ;;  %2515 = vmatprep.subr.mxu1 %v1304_v15  ;;  %v573_v25 = vld [vmem:[#allocation2 + $0xe1] sm:$0xff] }
 0x175   : > { %2516 = vmatpush3.msra.mxu1 %v1304_v15  ;;  %2517 = vmatprep.mubr.f32.mxu1 %v3506_v14  ;;  %v592_v14 = vld [vmem:[#allocation2 + $0xda] sm:$0xff] }
 0x176   : > { %2518 = vmatmul.mubr.f32.vlgmr.msra.gmra.mxu1 %v3510_v17  ;;  %1389 = vmatprep.mubr.f32.mxu0 %v3528_v31  ;;  %v593_v17 = vld [vmem:[#allocation2 + $0xe2] sm:$0xff] }
 0x177   : > { %2520 = vmatprep.mubr.f32.mxu1 %v3518_v23  ;;  %v552_v23 = vld [vmem:[#allocation2 + $0xd8] sm:$0xff] }
 0x178   : > { %1390 = vmatmul.mubr.f32.gmra.mxu0 %v3532_v34 }
 0x179   : > { %1394 = vmatprep.mubr.f32.mxu0 %v3540_v40 }
 0x17a   : > { %2521 = vmatmul.mubr.f32.gmra.mxu1 %v3522_v26  ;;  %v553_v26 = vld [vmem:[#allocation2 + $0xe0] sm:$0xff] }
 0x17b   : > { %2523 = vmatprep.mubr.f32.mxu1 %v3530_v32 }
 0x17c   : > { %1395 = vmatmul.mubr.f32.gmra.mxu0 %v3544_v43 }
 0x17d   : > { %1399 = vmatprep.mubr.f32.mxu0 %v3552_v49 }
 0x17e   : > { %2524 = vmatmul.mubr.f32.gmra.mxu1 %v3534_v35 }
 0x17f   : > { %2526 = vmatprep.mubr.f32.mxu1 %v3542_v41 }
 0x180   : > { %1400 = vmatmul.mubr.f32.gmra.mxu0 %v3556_v52 }
 0x181   : > { %1404 = vmatprep.mubr.f32.mxu0 %v3564_v58 }
 0x182   : > { %2527 = vmatmul.mubr.f32.gmra.mxu1 %v3546_v44 }
 0x183   : > { %2529 = vmatprep.mubr.f32.mxu1 %v3554_v50 }
 0x184   : > { %1405 = vmatmul.mubr.f32.gmra.mxu0 %v3568_v61 }
 0x185   : > { %1409 = vmatprep.mubr.f32.mxu0 %v3576_v3 }
 0x186   : > { %2530 = vmatmul.mubr.f32.gmra.mxu1 %v3558_v53 }
 0x187   : > { %2532 = vmatprep.mubr.f32.mxu1 %v3566_v59 }
 0x188   : > { %1410 = vmatmul.mubr.f32.gmra.mxu0 %v3580_v10 }
 0x189   : > { %1414 = vmatprep.mubr.f32.mxu0 %v3588_v20 }
 0x18a   : > { %2533 = vmatmul.mubr.f32.gmra.mxu1 %v3570_v62 }
 0x18b   : > { %2535 = vmatprep.mubr.f32.mxu1 %v3578_v4 }
 0x18c   : > { %1415 = vmatmul.mubr.f32.gmra.mxu0 %v3590_v27 }
 0x18d   : > { %1419 = vmatprep.mubr.f32.mxu0 %v3593_v30 }
 0x18e   : > { %2536 = vmatmul.mubr.f32.gmra.mxu1 %v3582_v11 }
 0x18f   : > { %2538 = vmatprep.mubr.f32.mxu1 %v592_v14 }
 0x190   : > { %1420 = vmatmul.mubr.f32.gmra.mxu0 %v3597_v38 }
 0x191   : > { %1424 = vmatprep.mubr.f32.mxu0 %v3599_v42 }
 0x192   : > { %2539 = vmatmul.mubr.f32.gmra.mxu1 %v593_v17 }
 0x194   : > { %1425 = vmatmul.mubr.f32.gmra.mxu0 %v3603_v46 }
 0x195   : > { %1429 = vmatprep.mubr.f32.mxu0 %v3606_v47 }
 0x198   : > { %1430 = vmatmul.mubr.f32.gmra.mxu0 %v3612_v54 }
 0x199   : > { %1434 = vmatprep.mubr.f32.mxu0 %v3614_v55 }
 0x19c   : > { %1435 = vmatmul.mubr.f32.gmra.mxu0 %v3620_v7 }
 0x19d   : > { %1439 = vmatprep.mubr.f32.mxu0 %v3622_v13 }
 0x1a0   : > { %1440 = vmatmul.mubr.f32.gmra.mxu0 %v3628_v16 }
 0x1a1   : > { %1444 = vmatprep.mubr.f32.mxu0 %v3630_v63 }
 0x1a4   : > { %1445 = vmatmul.mubr.f32.gmra.mxu0 %v3636_v2 }
 0x1a5   : > { %1449 = vmatprep.mubr.f32.mxu0 %v3638_v9 }
 0x1a8   : > { %1450 = vmatmul.mubr.f32.gmra.mxu0 %v3644_v18 }
 0x1a9   : > { %1454 = vmatprep.mubr.f32.mxu0 %v572_v22 }
 0x1ac   : > { %1455 = vmatmul.mubr.f32.gmra.mxu0 %v552_v23 }
 0x1ad   : > { %1459 = vmatprep.mubr.f32.mxu0 %v573_v25 }
 0x1b0   : > { %1460 = vmatmul.mubr.f32.gmra.mxu0 %v553_v26 }
 0x1c5   : > { %v2069_v31 = vpop.f32.mrf.mxu0  ;;  %v2407_v32 = vpop.f32.mrf.mxu1 }
 0x1c7   : > { %v2070_v34 = vpop.f32.mrf.mxu0  ;;  %v902_v35 = vpop.f32.mrf.mxu1 }
 0x1c8   : > { %v2071_v40 = vadd.f32 %v2070_v34, %v2069_v31 }
 0x1ca   : > { %v3720_v41 = vadd.f32 %v2071_v40, %v902_v35  ;;  %v2072_v43 = vpop.f32.mrf.mxu0  ;;  %v2410_v44 = vpop.f32.mrf.mxu1 }
 0x1cc   : > { %v2073_v49 = vpop.f32.mrf.mxu0  ;;  %v912_v50 = vpop.f32.mrf.mxu1 }
 0x1cd   : > { %v2074_v52 = vadd.f32 %v2073_v49, %v2072_v43 }
 0x1cf   : > { %v3722_v53 = vadd.f32 %v2407_v32, %v2074_v52  ;;  %v2075_v58 = vpop.f32.mrf.mxu0  ;;  %v2413_v59 = vpop.f32.mrf.mxu1 }
 0x1d1   : > { %v2076_v61 = vpop.f32.mrf.mxu0  ;;  %v922_v62 = vpop.f32.mrf.mxu1 }
 0x1d2   : > { %v2077_v3 = vadd.f32 %v2076_v61, %v2075_v58 }
 0x1d4   : > { %v3724_v4 = vadd.f32 %v2077_v3, %v912_v50  ;;  %v2078_v10 = vpop.f32.mrf.mxu0  ;;  %v2416_v11 = vpop.f32.mrf.mxu1 }
 0x1d6   : > { %v2079_v20 = vpop.f32.mrf.mxu0  ;;  %v932_v27 = vpop.f32.mrf.mxu1 }
 0x1d7   : > { %v2080_v30 = vadd.f32 %v2079_v20, %v2078_v10 }
 0x1d9   : > { %v3726_v38 = vadd.f32 %v2410_v44, %v2080_v30  ;;  %v2081_v42 = vpop.f32.mrf.mxu0  ;;  %v2419_v46 = vpop.f32.mrf.mxu1 }
 0x1db   : > { %v2082_v47 = vpop.f32.mrf.mxu0  ;;  %v942_v54 = vpop.f32.mrf.mxu1 }
 0x1dc   : > { %v2083_v55 = vadd.f32 %v2082_v47, %v2081_v42 }
 0x1de   : > { %v3728_v7 = vadd.f32 %v2083_v55, %v922_v62  ;;  %v2084_v13 = vpop.f32.mrf.mxu0  ;;  %v2422_v16 = vpop.f32.mrf.mxu1 }
 0x1e0   : > { %v2085_v63 = vpop.f32.mrf.mxu0  ;;  %v952_v2 = vpop.f32.mrf.mxu1 }
 0x1e1   : > { %v2086_v9 = vadd.f32 %v2085_v63, %v2084_v13 }
 0x1e3   : > { %v3730_v18 = vadd.f32 %v2413_v59, %v2086_v9  ;;  %v2087_v19 = vpop.f32.mrf.mxu0  ;;  %v2425_v21 = vpop.f32.mrf.mxu1 }
 0x1e5   : > { %v2088_v24 = vpop.f32.mrf.mxu0  ;;  %v962_v28 = vpop.f32.mrf.mxu1 }
 0x1e6   : > { %v2089_v29 = vadd.f32 %v2088_v24, %v2087_v19 }
 0x1e8   : > { %v3732_v33 = vadd.f32 %v2089_v29, %v932_v27  ;;  %v2090_v36 = vpop.f32.mrf.mxu0  ;;  %v2428_v37 = vpop.f32.mrf.mxu1 }
 0x1ea   : > { %v2091_v39 = vpop.f32.mrf.mxu0  ;;  %v972_v45 = vpop.f32.mrf.mxu1 }
 0x1eb   : > { %v2092_v48 = vadd.f32 %v2091_v39, %v2090_v36 }
 0x1ed   : > { %v3734_v51 = vadd.f32 %v2416_v11, %v2092_v48  ;;  %v2093_v5 = vpop.f32.mrf.mxu0  ;;  %v3736_v56 = vpop.f32.mrf.mxu1 }
 0x1ef   : > { %v2094_v6 = vpop.f32.mrf.mxu0  ;;  %v3738_v8 = vpop.f32.mrf.mxu1 }
 0x1f0   : > { %v2095_v57 = vadd.f32 %v2094_v6, %v2093_v5 }
 0x1f1   : > { %v2096_v60 = vpop.f32.mrf.mxu0  ;;  %v3740_v0 = vpop.f32.mrf.mxu1 }
 0x1f2   : > { %v3742_v1 = vadd.f32 %v2095_v57, %v942_v54 }
 0x1f3   : > { %v2097_v12 = vpop.f32.mrf.mxu0  ;;  %v3744_v15 = vpop.f32.mrf.mxu1 }
 0x1f4   : > { %v2098_v14 = vadd.f32 %v2097_v12, %v2096_v60 }
 0x1f5   : > { %v2099_v17 = vpop.f32.mrf.mxu0  ;;  %v3746_v22 = vpop.f32.mrf.mxu1 }
 0x1f6   : > { %v3748_v23 = vadd.f32 %v2419_v46, %v2098_v14 }
 0x1f7   : > { %v2100_v25 = vpop.f32.mrf.mxu0  ;;  %v3750_v26 = vpop.f32.mrf.mxu1 }
 0x1f8   : > { %v2101_v31 = vadd.f32 %v2100_v25, %v2099_v17 }
 0x1f9   : > { %v2102_v32 = vpop.f32.mrf.mxu0  ;;  %v3752_v34 = vpop.f32.mrf.mxu1 }
 0x1fa   : > { %v3754_v35 = vadd.f32 %v2101_v31, %v952_v2 }
 0x1fb   : > { %v2103_v40 = vpop.f32.mrf.mxu0  ;;  %v3756_v43 = vpop.f32.mrf.mxu1 }
 0x1fc   : > { %v2104_v44 = vadd.f32 %v2103_v40, %v2102_v32 }
 0x1fd   : > { %v2105_v49 = vpop.f32.mrf.mxu0  ;;  %v3758_v50 = vpop.f32.mrf.mxu1 }
 0x1fe   : > { %v3760_v52 = vadd.f32 %v2422_v16, %v2104_v44 }
 0x1ff   : > { %v2106_v58 = vpop.f32.mrf.mxu0  ;;  %v3762_v59 = vpop.f32.mrf.mxu1 }
 0x200   : > { %4236 = vst [vmem:[#allocation40_spill] sm:$0xff] %v3760_v52  ;;  %v2107_v61 = vadd.f32 %v2106_v58, %v2105_v49 }
 0x201   : > { %v2108_v62 = vpop.f32.mrf.mxu0  ;;  %v3764_v3 = vpop.f32.mrf.mxu1 }
 0x202   : > { %v3766_v10 = vadd.f32 %v2107_v61, %v962_v28 }
 0x203   : > { %v2109_v11 = vpop.f32.mrf.mxu0  ;;  %v3768_v20 = vpop.f32.mrf.mxu1 }
 0x204   : > { %4237 = vst [vmem:[#allocation41_spill] sm:$0xff] %v3766_v10  ;;  %v2110_v27 = vadd.f32 %v2109_v11, %v2108_v62 }
 0x205   : > { %v2111_v30 = vpop.f32.mrf.mxu0  ;;  %v3770_v42 = vpop.f32.mrf.mxu1 }
 0x206   : > { %v968_v46 = vadd.f32 %v2425_v21, %v2110_v27 }
 0x207   : > { %v2112_v47 = vpop.f32.mrf.mxu0  ;;  %v3772_v54 = vpop.f32.mrf.mxu1 }
 0x208   : > { %v2113_v55 = vadd.f32 %v2112_v47, %v2111_v30 }
 0x209   : > { %v2114_v13 = vpop.f32.mrf.mxu0  ;;  %v3774_v16 = vpop.f32.mrf.mxu1 }
 0x20a   : > { %v3776_v63 = vadd.f32 %v2113_v55, %v972_v45 }
 0x20b   : > { %v2115_v2 = vpop.f32.mrf.mxu0  ;;  %v3778_v9 = vpop.f32.mrf.mxu1 }
 0x20c   : > { %4238 = vst [vmem:[#allocation42_spill] sm:$0xff] %v3776_v63  ;;  %v2116_v19 = vadd.f32 %v2115_v2, %v2114_v13 }
 0x20d   : > { %v3780_v24 = vpop.f32.mrf.mxu1  ;;  %v2463_v28 = vpop.f32.mrf.mxu0 }
 0x20e   : > { %v978_v29 = vadd.f32 %v2428_v37, %v2116_v19 }
 0x20f   : > { %v3782_v36 = vpop.f32.mrf.mxu1  ;;  %v1192_v21 = vpop.f32.mrf.mxu0 }
 0x211   : > { %v3784_v39 = vpop.f32.mrf.mxu1  ;;  %v3786_v48 = vpop.f32.mrf.mxu0 }
 0x213   : > { %v3788_v5 = vpop.f32.mrf.mxu1  ;;  %v1202_v6 = vpop.f32.mrf.mxu0 }
 0x215   : > { %v3790_v45 = vpop.f32.mrf.mxu1 }
 0x216   : > { %v3792_v57 = vpop.f32.mrf.mxu0 }
 0x217   : > { %v3794_v60 = vpop.f32.mrf.mxu1 }
 0x218   : > { %v3796_v12 = vpop.f32.mrf.mxu0 }
 0x219   : > { %v3798_v14 = vpop.f32.mrf.mxu1 }
 0x21a   : > { %v3800_v37 = vpop.f32.mrf.mxu0 }
 0x21b   : > { %v3802_v17 = vpop.f32.mrf.mxu1 }
 0x21c   : > { %v3804_v25 = vpop.f32.mrf.mxu0 }
 0x21d   : > { %v3806_v31 = vpop.f32.mrf.mxu1 }
 0x21e   : > { %4239 = vst [vmem:[#allocation43_spill] sm:$0xff] %v3806_v31  ;;  %v3808_v32 = vpop.f32.mrf.mxu0 }
 0x21f   : > { %v3810_v40 = vpop.f32.mrf.mxu1 }
 0x220   : > { %4240 = vst [vmem:[#allocation44_spill] sm:$0xff] %v3810_v40  ;;  %v3812_v44 = vpop.f32.mrf.mxu0  ;;  %v2183_v40 = vadd.f32 %v3738_v8, %v3736_v56  ;;  %v2189_v56 = vadd.f32 %v3750_v26, %v3746_v22 }
 0x222   : > { %v3814_v49 = vpop.f32.mrf.mxu0 }
 0x223   : > { %4241 = vst [vmem:[#allocation45_spill] sm:$0xff] %v3814_v49  ;;  %v2220_v58 = vpop.f32.mrf.mxu1 }
 0x224   : > { %v3816_v61 = vpop.f32.mrf.mxu0 }
 0x225   : > { %v2221_v62 = vpop.f32.mrf.mxu1 }
 0x226   : > { %v2222_v11 = vadd.f32 %v2221_v62, %v2220_v58 }
 0x228   : > { %v1113_v27 = vadd.f32 %v2222_v11, %v968_v46  ;;  %v2481_v30 = vpop.f32.mrf.mxu0 }
 0x229   : > { %v3818_v47 = vpop.f32.mrf.mxu1 }
 0x22a   : > { %4242 = vst [vmem:[#allocation46_spill] sm:$0xff] %v3818_v47  ;;  %v3820_v55 = vadd.f32 %v2481_v30, %v1113_v27  ;;  %v3822_v13 = vpop.f32.mrf.mxu0  ;;  %v2186_v30 = vadd.f32 %v3744_v15, %v3740_v0 }
 0x22b   : > { %4244 = vst [vmem:[#allocation48_spill] sm:$0xff] %v3822_v13  ;;  %v3824_v2 = vpop.f32.mrf.mxu1 }
 0x22c   : > { %4243 = vst [vmem:[#allocation47_spill] sm:$0xff] %v3820_v55  ;;  %4245 = vst [vmem:[#allocation49_spill] sm:$0xff] %v3824_v2  ;;  %v1048_v55 = vadd.f32 %v2183_v40, %v3720_v41  ;;  %v1053_v8 = vadd.f32 %v2186_v30, %v3722_v53 }
 0x22e   : > { %v2484_v19 = vpop.f32.mrf.mxu0  ;;  %v1193_v47 = vadd.f32 %v1192_v21, %v1048_v55  ;;  %v1198_v0 = vadd.f32 %v2463_v28, %v1053_v8  ;;  %v1058_v21 = vadd.f32 %v2189_v56, %v3724_v4 }
 0x22f   : > { %v2226_v63 = vpop.f32.mrf.mxu1 }
 0x230   : > { %v3826_v10 = vpop.f32.mrf.mxu0 }
 0x231   : > { %4246 = vst [vmem:[#allocation50_spill] sm:$0xff] %v3826_v10  ;;  %v2227_v49 = vpop.f32.mrf.mxu1 }
 0x232   : > { %v2228_v52 = vadd.f32 %v2227_v49, %v2226_v63 }
 0x234   : > { %v1123_v58 = vadd.f32 %v2228_v52, %v978_v29  ;;  %v2293_v46 = vpop.f32.mrf.mxu0 }
 0x236   : > { %v3830_v62 = vadd.f32 %v2484_v19, %v1123_v58  ;;  %v2294_v11 = vpop.f32.mrf.mxu0  ;;  %v2519_v27 = vpop.f32.mrf.mxu1 }
 0x237   : > { %v2295_v13 = vadd.f32 %v2294_v11, %v2293_v46  ;;  %v2198_v11 = vadd.f32 %v3768_v20, %v3764_v3 }
 0x238   : > { %v2296_v2 = vpop.f32.mrf.mxu0  ;;  %v1531_v10 = vpop.f32.mrf.mxu1 }
 0x239   : > { %v1532_v63 = vadd.f32 %v2295_v13, %v1531_v10  ;;  %v2192_v10 = vadd.f32 %v3756_v43, %v3752_v34  ;;  %v1073_v3 = vadd.f32 %v2198_v11, %v3730_v18  ;;  %v2210_v11 = vadd.f32 %v3788_v5, %v3784_v39 }
 0x23a   : > { %v2297_v49 = vpop.f32.mrf.mxu0  ;;  %v2522_v31 = vpop.f32.mrf.mxu1 }
 0x23b   : > { %v3838_v52 = vadd.f32 %v1532_v63, %v1193_v47  ;;  %v2298_v29 = vadd.f32 %v2297_v49, %v2296_v2  ;;  %v1203_v47 = vadd.f32 %v1202_v6, %v1058_v21  ;;  %v2195_v2 = vadd.f32 %v3762_v59, %v3758_v50 }
 0x23c   : > { %v2299_v19 = vpop.f32.mrf.mxu0  ;;  %v1541_v40 = vpop.f32.mrf.mxu1  ;;  %v1063_v58 = vadd.f32 %v2192_v10, %v3726_v38  ;;  %v2204_v21 = vadd.f32 %v3778_v9, %v3774_v16  ;;  %v1093_v39 = vadd.f32 %v2210_v11, %v3748_v23 }
 0x23d   : > { %1626 = vst [vmem:[%s3478_s29] sm:$0xff] %v3838_v52  ;;  %v1537_v41 = vadd.f32 %v2519_v27, %v2298_v29  ;;  %v1068_v63 = vadd.f32 %v2195_v2, %v3728_v7  ;;  %v2201_v7 = vadd.f32 %v3772_v54, %v3770_v42  ;;  %v2207_v2 = vadd.f32 %v3782_v36, %v3780_v24 }
 0x23e   : > { %v2300_v15 = vpop.f32.mrf.mxu0  ;;  %v2525_v13 = vpop.f32.mrf.mxu1  ;;  %v1208_v43 = vadd.f32 %v3786_v48, %v1063_v58  ;;  %v1083_v16 = vadd.f32 %v2204_v21, %v3734_v51 }
 0x23f   : > { %v3845_v22 = vadd.f32 %v1537_v41, %v1198_v0  ;;  %v2301_v26 = vadd.f32 %v2300_v15, %v2299_v19  ;;  %v1213_v48 = vadd.f32 %v3796_v12, %v1068_v63  ;;  %v1218_v12 = vadd.f32 %v3792_v57, %v1073_v3 }
 0x240   : > { %v2302_v53 = vpop.f32.mrf.mxu0  ;;  %v1551_v30 = vpop.f32.mrf.mxu1  ;;  %v1078_v42 = vadd.f32 %v2201_v7, %v3732_v33  ;;  %v1088_v24 = vadd.f32 %v2207_v2, %v3742_v1 }
 0x241   : > { %1627 = vst [vmem:[%s3478_s29 + $0x8] sm:$0xff] %v3845_v22  ;;  %v1542_v55 = vadd.f32 %v2301_v26, %v1541_v40  ;;  %v1642_v38 = vadd.f32 %v3845_v22, %v3838_v52 }
 0x242   : > { %v2303_v28 = vpop.f32.mrf.mxu0  ;;  %v2528_v8 = vpop.f32.mrf.mxu1 }
 0x243   : > { %v3852_v46 = vadd.f32 %v1542_v55, %v1203_v47  ;;  %v2304_v34 = vadd.f32 %v2303_v28, %v2302_v53  ;;  %v1223_v47 = vadd.f32 %v3804_v25, %v1078_v42  ;;  %v4250_v42 = vld [vmem:[#allocation45_spill] sm:$0xff] }
 0x244   : > { %v2305_v4 = vpop.f32.mrf.mxu0  ;;  %v1561_v10 = vpop.f32.mrf.mxu1 }
 0x245   : > { %1628 = vst [vmem:[%s3478_s29 + $0x10] sm:$0xff] %v3852_v46  ;;  %v1547_v6 = vadd.f32 %v2522_v31, %v2304_v34  ;;  %v1643_v56 = vadd.f32 %v1642_v38, %v3852_v46  ;;  %v1228_v34 = vadd.f32 %v3800_v37, %v1083_v16 }
 0x246   : > { %v2306_v27 = vpop.f32.mrf.mxu0 }
 0x247   : > { %v3862_v50 = vadd.f32 %v1547_v6, %v1208_v43  ;;  %v2307_v59 = vadd.f32 %v2306_v27, %v2305_v4 }
 0x248   : > { %v2308_v49 = vpop.f32.mrf.mxu0 }
 0x249   : > { %1629 = vst [vmem:[%s3478_s29 + $0x18] sm:$0xff] %v3862_v50  ;;  %v1552_v31 = vadd.f32 %v2307_v59, %v1551_v30  ;;  %v1644_v19 = vadd.f32 %v1643_v56, %v3862_v50  ;;  %v1233_v30 = vadd.f32 %v3812_v44, %v1088_v24  ;;  %v1238_v56 = vadd.f32 %v3808_v32, %v1093_v39 }
 0x24a   : > { %v2309_v20 = vpop.f32.mrf.mxu0 }
 0x24b   : > { %v3871_v29 = vadd.f32 %v1552_v31, %v1213_v48  ;;  %v2310_v0 = vadd.f32 %v2309_v20, %v2308_v49  ;;  %v2213_v49 = vadd.f32 %v3794_v60, %v3790_v45 }
 0x24c   : > { %v2311_v41 = vpop.f32.mrf.mxu0 }
 0x24d   : > { %1630 = vst [vmem:[%s3478_s29 + $0x20] sm:$0xff] %v3871_v29  ;;  %v1645_v15 = vadd.f32 %v1644_v19, %v3871_v29  ;;  %v1557_v40 = vadd.f32 %v2525_v13, %v2310_v0  ;;  %v2531_v13 = vpop.f32.mrf.mxu1  ;;  %v1098_v45 = vadd.f32 %v2213_v49, %v3754_v35 }
 0x24e   : > { %v2312_v18 = vpop.f32.mrf.mxu0 }
 0x24f   : > { %v3881_v54 = vadd.f32 %v1557_v40, %v1218_v12  ;;  %v2313_v26 = vadd.f32 %v2312_v18, %v2311_v41  ;;  %v1571_v6 = vpop.f32.mrf.mxu1  ;;  %v1243_v19 = vadd.f32 %v3816_v61, %v1098_v45  ;;  %v4248_v40 = vld [vmem:[#allocation44_spill] sm:$0xff] }
 0x250   : > { %v2314_v53 = vpop.f32.mrf.mxu0 }
 0x251   : > { %1631 = vst [vmem:[%s3478_s29 + $0x28] sm:$0xff] %v3881_v54  ;;  %v1562_v57 = vadd.f32 %v2313_v26, %v1561_v10  ;;  %v1646_v55 = vadd.f32 %v1645_v15, %v3881_v54  ;;  %v2534_v59 = vpop.f32.mrf.mxu1  ;;  %v4247_v15 = vld [vmem:[#allocation43_spill] sm:$0xff] }
 0x252   : > { %v2315_v28 = vpop.f32.mrf.mxu0  ;;  %v2219_v18 = vadd.f32 %v4248_v40, %v4247_v15 }
 0x253   : > { %v3890_v33 = vadd.f32 %v1562_v57, %v1223_v47  ;;  %v2316_v9 = vadd.f32 %v2315_v28, %v2314_v53  ;;  %v1581_v20 = vpop.f32.mrf.mxu1 }
 0x254   : > { %v2317_v58 = vpop.f32.mrf.mxu0 }
 0x255   : > { %1632 = vst [vmem:[%s3478_s29 + $0x30] sm:$0xff] %v3890_v33  ;;  %v1647_v25 = vadd.f32 %v1646_v55, %v3890_v33  ;;  %v1567_v4 = vadd.f32 %v2528_v8, %v2316_v9  ;;  %v2216_v8 = vadd.f32 %v3802_v17, %v3798_v14  ;;  %v2537_v12 = vpop.f32.mrf.mxu1  ;;  %v4249_v14 = vld [vmem:[#allocation40_spill] sm:$0xff]  ;;  %v4252_v55 = vld [vmem:[#allocation41_spill] sm:$0xff]  ;;  %v4253_v9 = vld [vmem:[#allocation46_spill] sm:$0xff] }
 0x256   : > { %v2318_v43 = vpop.f32.mrf.mxu0  ;;  %v1108_v28 = vadd.f32 %v2219_v18, %v4252_v55 }
 0x257   : > { %v3899_v51 = vadd.f32 %v1567_v4, %v1228_v34  ;;  %v2319_v36 = vadd.f32 %v2318_v43, %v2317_v58  ;;  %v1103_v17 = vadd.f32 %v2216_v8, %v4249_v14  ;;  %v1591_v57 = vpop.f32.mrf.mxu1  ;;  %v4254_v58 = vld [vmem:[#allocation49_spill] sm:$0xff] }
 0x258   : > { %v2320_v27 = vpop.f32.mrf.mxu0  ;;  %v2225_v34 = vadd.f32 %v4254_v58, %v4253_v9 }
 0x259   : > { %1633 = vst [vmem:[%s3478_s29 + $0x38] sm:$0xff] %v3899_v51  ;;  %v1572_v37 = vadd.f32 %v2319_v36, %v1571_v6  ;;  %v1648_v63 = vadd.f32 %v1647_v25, %v3899_v51  ;;  %v1248_v26 = vadd.f32 %v4250_v42, %v1103_v17  ;;  %v4255_v25 = vld [vmem:[#allocation48_spill] sm:$0xff]  ;;  %v2540_v24 = vpop.f32.mrf.mxu1 }
 0x25a   : > { %v2321_v38 = vpop.f32.mrf.mxu0  ;;  %v1253_v4 = vadd.f32 %v4255_v25, %v1108_v28 }
 0x25b   : > { %v3908_v1 = vadd.f32 %v1572_v37, %v1233_v30  ;;  %v2322_v5 = vadd.f32 %v2321_v38, %v2320_v27  ;;  %v4257_v37 = vld [vmem:[#allocation42_spill] sm:$0xff]  ;;  %v1601_v39 = vpop.f32.mrf.mxu1 }
 0x25c   : > { %v2323_v48 = vpop.f32.mrf.mxu0 }
 0x25d   : > { %1634 = vst [vmem:[%s3478_s29 + $0x40] sm:$0xff] %v3908_v1  ;;  %v1649_v44 = vadd.f32 %v1648_v63, %v3908_v1  ;;  %v1577_v31 = vadd.f32 %v2531_v13, %v2322_v5  ;;  %v1118_v63 = vadd.f32 %v2225_v34, %v4257_v37  ;;  %v4258_v5 = vld [vmem:[#allocation47_spill] sm:$0xff] }
 0x25e   : > { %v2324_v3 = vpop.f32.mrf.mxu0 }
 0x25f   : > { %v3917_v23 = vadd.f32 %v1577_v31, %v1238_v56  ;;  %v2325_v60 = vadd.f32 %v2324_v3, %v2323_v48  ;;  %v4259_v31 = vld [vmem:[#allocation50_spill] sm:$0xff] }
 0x260   : > { %v2326_v7 = vpop.f32.mrf.mxu0  ;;  %v1263_v3 = vadd.f32 %v4259_v31, %v1118_v63 }
 0x261   : > { %1635 = vst [vmem:[%s3478_s29 + $0x48] sm:$0xff] %v3917_v23  ;;  %v1582_v32 = vadd.f32 %v2325_v60, %v1581_v20  ;;  %v1650_v0 = vadd.f32 %v1649_v44, %v3917_v23 }
 0x262   : > { %v2327_v41 = vpop.f32.mrf.mxu0 }
 0x263   : > { %v3926_v35 = vadd.f32 %v1582_v32, %v1243_v19  ;;  %v2328_v10 = vadd.f32 %v2327_v41, %v2326_v7 }
 0x264   : > { %v2329_v21 = vpop.f32.mrf.mxu0 }
 0x265   : > { %1636 = vst [vmem:[%s3478_s29 + $0x50] sm:$0xff] %v3926_v35  ;;  %v1651_v61 = vadd.f32 %v1650_v0, %v3926_v35  ;;  %v1587_v53 = vadd.f32 %v2534_v59, %v2328_v10 }
 0x266   : > { %v2330_v47 = vpop.f32.mrf.mxu0 }
 0x267   : > { %v3933_v13 = vadd.f32 %v1587_v53, %v1248_v26  ;;  %v2331_v2 = vadd.f32 %v2330_v47, %v2329_v21 }
 0x268   : > { %v2332_v16 = vpop.f32.mrf.mxu0 }
 0x269   : > { %1637 = vst [vmem:[%s3478_s29 + $0x58] sm:$0xff] %v3933_v13  ;;  %v1592_v43 = vadd.f32 %v2331_v2, %v1591_v57  ;;  %v1652_v6 = vadd.f32 %v1651_v61, %v3933_v13 }
 0x26a   : > { %v2333_v11 = vpop.f32.mrf.mxu0 }
 0x26b   : > { %v3941_v36 = vadd.f32 %v1592_v43, %v1253_v4  ;;  %v2334_v27 = vadd.f32 %v2333_v11, %v2332_v16 }
 0x26c   : > { %v2335_v30 = vpop.f32.mrf.mxu0 }
 0x26d   : > { %1638 = vst [vmem:[%s3478_s29 + $0x60] sm:$0xff] %v3941_v36  ;;  %v1653_v38 = vadd.f32 %v1652_v6, %v3941_v36  ;;  %v1597_v59 = vadd.f32 %v2537_v12, %v2334_v27 }
 0x26e   : > { %v2336_v49 = vpop.f32.mrf.mxu0 }
 0x26f   : > { %v3949_v48 = vadd.f32 %v1597_v59, %v4258_v5  ;;  %v2337_v56 = vadd.f32 %v2336_v49, %v2335_v30 }
 0x270   : > { %v2338_v44 = vpop.f32.mrf.mxu0 }
 0x271   : > { %1639 = vst [vmem:[%s3478_s29 + $0x68] sm:$0xff] %v3949_v48  ;;  %v1602_v20 = vadd.f32 %v2337_v56, %v1601_v39  ;;  %v1654_v8 = vadd.f32 %v1653_v38, %v3949_v48 }
 0x272   : > { %v2339_v45 = vpop.f32.mrf.mxu0 }
 0x273   : > { %v3959_v60 = vadd.f32 %v1602_v20, %v1263_v3  ;;  %v2340_v7 = vadd.f32 %v2339_v45, %v2338_v44 }
 0x275   : > { %1640 = vst [vmem:[%s3478_s29 + $0x70] sm:$0xff] %v3959_v60  ;;  %v1655_v19 = vadd.f32 %v1654_v8, %v3959_v60  ;;  %v1607_v32 = vadd.f32 %v2540_v24, %v2340_v7 }
 0x277   : > { %v3973_v0 = vadd.f32 %v1607_v32, %v3830_v62 }
 0x279   : > { %1641 = vst [vmem:[%s3478_s29 + $0x78] sm:$0xff] %v3973_v0  ;;  %v1656_v41 = vadd.f32 %v1655_v19, %v3973_v0 }
 0x27a   : > { %2850 = shalt.err (!%p2847_p1)
}
 0x27b   : > { %s2851_s29 = scalar_lea.hbm %s3968_s12, 2048  ;;  %s2855_s14 = scalar_lea.hbm %s4261_s6, 8192 }
 0x27c   : > { %p2852_p6 = scmp.ne.s32.totalorder %s3968_s12, %s2851_s29  ;;  %p2856_p7 = scmp.lt.s32.totalorder %s3968_s12, %s4261_s6 }
 0x27d   : > { %p2857_p11 = scmp.lt.s32.totalorder %s2855_s14, %s2851_s29 }
 0x27e   : > { %p2853_p13 = pnand %p2852_p6, %p4262_p8 }
 0x27f   : > { %p2858_p12 = por %p2857_p11, %p2856_p7 }
 0x280   : > { %p2854_p3 = pneg %p2853_p13 }
 0x282   : > { %p2859_p4 = pnand %p2858_p12, %p2854_p3 }
 0x284   : > { %2862 = shalt.err (!%p2859_p4)
}
 0x285   : > { %s3083_s8 = smov 128   ;;  %s3084_s7 = smov 8   ;;  %v1657_v62 = vrot.slane %v1656_v41, 4 }
 0x286   : > { %2551 = dma.vmem_to_hbm [thread:$0]  (%p4262_p8), %s3970_s4, 2048, %s3968_s12, %s1720_s30, %s3083_s8, %s3083_s8, %s3084_s7  }
 0x287   : > { %v1658_v12 = vadd.f32 %v1657_v62, %v1656_v41  ;;  %s2024_s27 = sshll.u32 %s3952_s16, 4  ;;  %s1761_s1 = sshll.u32 %s432_s19, 4  ;;  %s1762_s1 = int_to_ptr.vmem [resolvable:$true] %s1761_s1 }
 0x288   : > { %s4263_s11 = sld [smem:[#allocation56_spill]]  ;;  %s4015_s4 = scalar_lea.sflag [#allocation13], %s375_s3 }
 0x289   : > { %v1659_v15 = vrot.slane %v1658_v12, 2  ;;  %s2863_s12 = scalar_lea.vmem %s1762_s1, 16  ;;  %s3085_s30 = smov [#allocation12]  }
 0x28a   : > { %p2864_p9 = scmp.ne.s32.totalorder %s1762_s1, %s2863_s12  ;;  %s2867_s9 = sshll.u32 %s3085_s30, 4  ;;  %s2868_s9 = int_to_ptr.vmem [resolvable:$false] %s2867_s9 }
 0x28b   : > { %v1660_v40 = vadd.f32 %v1659_v15, %v1658_v12  ;;  %s2869_s24 = scalar_lea.vmem %s2868_s9, 32  ;;  %p2870_p0 = scmp.lt.s32.totalorder %s1762_s1, %s2868_s9 }
 0x28c   : > { %p2865_p10 = pnand %p2864_p9, %p4262_p8  ;;  %p2871_p5 = scmp.lt.s32.totalorder %s2869_s24, %s2863_s12 }
 0x28d   : > { %v1661_v18 = vrot.slane %v1660_v40, 1 }
 0x28e   : > { %s4264_s14 = smov %s4263_s11  ;;  %s4009_s29 = scalar_lea.hbm %s4263_s11, %s2024_s27 }
 0x28f   : > { %v1662_v14 = vadd.f32 %v1661_v18, %v1660_v40  ;;  %p2866_p2 = pneg %p2865_p10  ;;  %p2872_p1 = por %p2871_p5, %p2870_p0 }
 0x291   : > { %v1663_v17 = vmul.f32 0.0078125, %v1662_v14  ;;  %1664 = vst [vmem:[%s432_s19] sm:$0x1] %v1662_v14  ;;  %p2873_p6 = pnand %p2872_p1, %p2866_p2 }
 0x293   : > { %2876 = shalt.err (!%p2873_p6)
}
 0x294   : > { %s2877_s15 = scalar_lea.hbm %s4009_s29, 16  ;;  %s2881_s20 = scalar_lea.hbm %s4264_s14, 64 }
 0x295   : > { %p2878_p13 = scmp.ne.s32.totalorder %s4009_s29, %s2877_s15  ;;  %p2882_p11 = scmp.lt.s32.totalorder %s4009_s29, %s4264_s14 }
 0x296   : > { %p2883_p12 = scmp.lt.s32.totalorder %s2881_s20, %s2877_s15 }
 0x297   : > { %p2879_p3 = pnand %p2878_p13, %p4262_p8 }
 0x298   : > { %p2884_p4 = por %p2883_p12, %p2882_p11 }
 0x299   : > { %p2880_p7 = pneg %p2879_p3 }
 0x29b   : > { %p2885_p9 = pnand %p2884_p4, %p2880_p7 }
 0x29d   : > { %2888 = shalt.err (!%p2885_p9)
}
 0x29e   : > { %2552 = dma.vmem_to_hbm [thread:$0]  (%p4262_p8), %s1762_s1, 16, %s4009_s29, %s4015_s4   ;;  %v1665_v10 = vsub.f32 %v3838_v52, %v1663_v17  ;;  %v1666_v21 = vsub.f32 %v3845_v22, %v1663_v17  ;;  %v1668_v42 = vsub.f32 %v3862_v50, %v1663_v17  ;;  %v1669_v26 = vsub.f32 %v3871_v29, %v1663_v17 }
 0x29f   : > { %v1670_v61 = vsub.f32 %v3881_v54, %v1663_v17  ;;  %v1671_v53 = vsub.f32 %v3890_v33, %v1663_v17  ;;  %v1672_v47 = vsub.f32 %v3899_v51, %v1663_v17  ;;  %v1673_v57 = vsub.f32 %v3908_v1, %v1663_v17  ;;  %s1776_s7 = sshll.u32 %s438_s18, 4  ;;  %s4265_s10 = sld [smem:[#allocation57_spill]]  ;;  %s1777_s7 = int_to_ptr.vmem [resolvable:$true] %s1776_s7 }
 0x2a0   : > { %v1674_v55 = vsub.f32 %v3917_v23, %v1663_v17  ;;  %v1675_v28 = vsub.f32 %v3926_v35, %v1663_v17  ;;  %v1676_v52 = vsub.f32 %v3933_v13, %v1663_v17  ;;  %v1677_v22 = vsub.f32 %v3941_v36, %v1663_v17  ;;  %s2889_s29 = scalar_lea.vmem %s1777_s7, 16  ;;  %s3086_s12 = smov [#allocation14]  }
 0x2a1   : > { %v1678_v50 = vsub.f32 %v3949_v48, %v1663_v17  ;;  %v1679_v29 = vsub.f32 %v3959_v60, %v1663_v17  ;;  %v1680_v54 = vsub.f32 %v3973_v0, %v1663_v17  ;;  %v1667_v33 = vsub.f32 %v3852_v46, %v1663_v17  ;;  %p2890_p10 = scmp.ne.s32.totalorder %s1777_s7, %s2889_s29  ;;  %s2893_s30 = sshll.u32 %s3086_s12, 4  ;;  %s2894_s30 = int_to_ptr.vmem [resolvable:$false] %s2893_s30 }
 0x2a2   : > { %v1681_v2 = vmul.f32 %v1665_v10, %v1665_v10  ;;  %v1682_v51 = vmul.f32 %v1666_v21, %v1666_v21  ;;  %v1684_v9 = vmul.f32 %v1668_v42, %v1668_v42  ;;  %v1685_v58 = vmul.f32 %v1669_v26, %v1669_v26  ;;  %s2895_s9 = scalar_lea.vmem %s2894_s30, 32  ;;  %p2896_p5 = scmp.lt.s32.totalorder %s1777_s7, %s2894_s30 }
 0x2a3   : > { %v1683_v16 = vmul.f32 %v1667_v33, %v1667_v33  ;;  %v1686_v34 = vmul.f32 %v1670_v61, %v1670_v61  ;;  %v1687_v25 = vmul.f32 %v1671_v53, %v1671_v53  ;;  %v1688_v43 = vmul.f32 %v1672_v47, %v1672_v47  ;;  %p2891_p2 = pnand %p2890_p10, %p4262_p8  ;;  %p2897_p1 = scmp.lt.s32.totalorder %s2895_s9, %s2889_s29 }
 0x2a4   : > { %v1697_v1 = vadd.f32 %v1682_v51, %v1681_v2  ;;  %v1689_v11 = vmul.f32 %v1673_v57, %v1673_v57  ;;  %v1690_v36 = vmul.f32 %v1674_v55, %v1674_v55  ;;  %v1691_v30 = vmul.f32 %v1675_v28, %v1675_v28 }
 0x2a5   : > { %v1692_v37 = vmul.f32 %v1676_v52, %v1676_v52  ;;  %v1693_v38 = vmul.f32 %v1677_v22, %v1677_v22  ;;  %v1694_v49 = vmul.f32 %v1678_v50, %v1678_v50  ;;  %v1695_v5 = vmul.f32 %v1679_v29, %v1679_v29  ;;  %s4266_s15 = smov %s4265_s10  ;;  %s1774_s11 = scalar_lea.hbm %s4265_s10, %s2024_s27 }
 0x2a6   : > { %v1698_v23 = vadd.f32 %v1697_v1, %v1683_v16  ;;  %v1696_v56 = vmul.f32 %v1680_v54, %v1680_v54  ;;  %p2892_p0 = pneg %p2891_p2  ;;  %p2898_p6 = por %p2897_p1, %p2896_p5 }
 0x2a8   : > { %v1699_v35 = vadd.f32 %v1698_v23, %v1684_v9  ;;  %p2899_p13 = pnand %p2898_p6, %p2892_p0 }
 0x2aa   : > { %v1700_v13 = vadd.f32 %v1699_v35, %v1685_v58 }
 0x2ac   : > { %v1701_v4 = vadd.f32 %v1700_v13, %v1686_v34 }
 0x2ae   : > { %v1702_v6 = vadd.f32 %v1701_v4, %v1687_v25 }
 0x2b0   : > { %v1703_v24 = vadd.f32 %v1702_v6, %v1688_v43 }
 0x2b2   : > { %v1704_v27 = vadd.f32 %v1703_v24, %v1689_v11 }
 0x2b4   : > { %v1705_v46 = vadd.f32 %v1704_v27, %v1690_v36 }
 0x2b6   : > { %v1706_v63 = vadd.f32 %v1705_v46, %v1691_v30 }
 0x2b8   : > { %v1707_v59 = vadd.f32 %v1706_v63, %v1692_v37 }
 0x2ba   : > { %v1708_v39 = vadd.f32 %v1707_v59, %v1693_v38 }
 0x2bc   : > { %v1709_v48 = vadd.f32 %v1708_v39, %v1694_v49 }
 0x2be   : > { %v1710_v44 = vadd.f32 %v1709_v48, %v1695_v5 }
 0x2c0   : > { %v1711_v31 = vadd.f32 %v1710_v44, %v1696_v56 }
 0x2c2   : > { %v1712_v3 = vrot.slane %v1711_v31, 4 }
 0x2c4   : > { %v1713_v20 = vadd.f32 %v1712_v3, %v1711_v31 }
 0x2c6   : > { %v1714_v8 = vrot.slane %v1713_v20, 2 }
 0x2c8   : > { %v1715_v45 = vadd.f32 %v1714_v8, %v1713_v20 }
 0x2ca   : > { %v1716_v60 = vrot.slane %v1715_v45, 1 }
 0x2cc   : > { %v1717_v7 = vadd.f32 %v1716_v60, %v1715_v45 }
 0x2ce   : > { %1718 = vst [vmem:[%s438_s18] sm:$0x1] %v1717_v7 }
 0x2cf   : > { %2902 = shalt.err (!%p2899_p13)
}
 0x2d0   : > { %s2903_s16 = scalar_lea.hbm %s1774_s11, 16  ;;  %s2907_s27 = scalar_lea.hbm %s4266_s15, 64 }
 0x2d1   : > { %p2904_p3 = scmp.ne.s32.totalorder %s1774_s11, %s2903_s16  ;;  %p2908_p12 = scmp.lt.s32.totalorder %s1774_s11, %s4266_s15 }
 0x2d2   : > { %p2909_p4 = scmp.lt.s32.totalorder %s2907_s27, %s2903_s16 }
 0x2d3   : > { %p2905_p7 = pnand %p2904_p3, %p4262_p8 }
 0x2d4   : > { %p2910_p9 = por %p2909_p4, %p2908_p12 }
 0x2d5   : > { %p2906_p11 = pneg %p2905_p7 }
 0x2d7   : > { %p2911_p10 = pnand %p2910_p9, %p2906_p11 }
 0x2d9   : > { %2914 = shalt.err (!%p2911_p10)
}
 0x2da   : > { %2553 = dma.vmem_to_hbm [thread:$0]  (%p4262_p8), %s1777_s7, 16, %s1774_s11, %s4015_s4  }
 0x2db PF: > { %p2584_p2 = scmp.ge.s32.totalorder %s3073_s13, 2  ;;  %s1788_s19 = sand.u32 1, %s3009_s21  }
 0x2dc   : > { %p4267_p0 = scmp.ne.s32.totalorder %s4199_s5, 0  ;;  %s1789_s20 = scalar_lea.sflag [#allocation5], %s1788_s19 }
 0x2de   : > { %p2572_p5 = pnand %p2584_p2, %p4267_p0 }
 0x2e0   : > { %p2573_p1 = pneg %p2572_p5 }
 0x2e2   : > { %3000 = dma.done.wait (%p2573_p1), %s1789_s20, 2048  }
 0x2e3   : > { %3002 = vsyncadd (%p2573_p1), %s1789_s20, 4294965248  ;;  %s4268_s0 = sadd.s32 4294967294, %s3073_s13  }
 0x2e4   : > { %s1797_s8 = sand.u32 1, %s4268_s0  }
 0x2e5   : > { %s1798_s1 = scalar_lea.sflag [#allocation13], %s1797_s8 }
 0x2e6   : > { %3004 = dma.done.wait (%p2573_p1), %s1798_s1, 32  }
 0x2e7   : > { %3006 = vsyncadd (%p2573_p1), %s1798_s1, 4294967264  ;;  %s30_s13 = sadd.s32 1, %s3073_s13   ;;  %s4270_s5 = sld [smem:[#allocation38_spill]] }
 0x2e8   : > { %p4079_p8 = scmp.ge.s32.totalorder %s30_s13, 6   ;;  %s4271_s24 = sld [smem:[#allocation22_spill]] }
 0x2e9   : > { %s4272_s25 = sld [smem:[#allocation23_spill]]  ;;  %s4282_s21 = smov %s3013_s22 }
 0x2ea   : > { %s4273_s4 = sld [smem:[#allocation24_spill]]  ;;  %s4283_s22 = smov %s3017_s23 }
 0x2eb   : > { %s4274_s29 = sld [smem:[#allocation37_spill]]  ;;  %s4285_s27 = smov %s3037_s28 }
 0x2ec   : > { %s4275_s30 = sld [smem:[#allocation26_spill]] }
 0x2ed   : > { %s4276_s7 = sld [smem:[#allocation27_spill]]  ;;  %s4284_s23 = smov %s4270_s5 }
 0x2ee   : > { %s4277_s8 = sld [smem:[#allocation39_spill]]  ;;  %29 = sbr.rel (!%p4079_p8) target bundleno = 25 (0x19), region = 153 }
 0x2ef   : > { %s4278_s9 = sld [smem:[#allocation30_spill]] }
 0x2f0   : > { %s4279_s10 = sld [smem:[#allocation31_spill]]  ;;  %s4286_s28 = smov %s4273_s4 }
 0x2f1   : > { %s4280_s11 = sld [smem:[#allocation32_spill]] }
 0x2f2   : > { %s4281_s12 = sld [smem:[#allocation33_spill]] }
 0x2f3   :  { %1810 = vsyncpa [#allocation4], 1 }
 0x2f4   :  { %1812 = vsyncpa [#allocation4 + $0x1], 1 }
 0x2f5   :  { %1813 = vsyncpa [#allocation7], 1 }
 0x2f6   :  { %1815 = vsyncpa [#allocation7 + $0x1], 1 }
 0x2f7   :  { %1816 = vsyncpa [#allocation10], 1 }
 0x2f8   :  { %1817 = vsyncpa [#allocation5], 1 }
 0x2f9   :  { %1819 = vsyncpa [#allocation5 + $0x1], 1 }
 0x2fa   :  { %1820 = vsyncpa [#allocation13], 1 }
 0x2fb   :  { %1822 = vsyncpa [#allocation13 + $0x1], 1 }

</bundles_post_ra>
